<compile_context>
chip_gen: v7x
topology: tpu7x:2x2x1
jax: 0.10.0
libtpu: 0.0.40
codegen_flags: <defaults>
</compile_context>

<pallas_src>
import jax
import jax.numpy as jnp
from jax.experimental import pallas as pl
from jax.experimental.pallas import tpu as pltpu

# ----------------------------- tiny Qwen2-like config -----------------------
VOCAB = 128
HIDDEN = 64
N_LAYERS = 2
N_HEADS = 4
N_KV_HEADS = 2
HEAD_DIM = 16
INTERMEDIATE = 128
RMS_EPS = 1e-6
ROPE_THETA = 10000.0

BATCH = 2
SEQ = 8

Q_DIM = N_HEADS * HEAD_DIM                    # 64
KV_DIM = N_KV_HEADS * HEAD_DIM                # 32
QKV_DIM = Q_DIM + 2 * KV_DIM                  # 128 -> lane-dense fused QKV
GROUP = N_HEADS // N_KV_HEADS                 # 2


def _rms(x, w):
    var = jnp.mean(x * x, axis=-1, keepdims=True)
    return x * jax.lax.rsqrt(var + RMS_EPS) * w


# ----------------------------- the single fused kernel ----------------------
def _qwen_kernel(h_ref, bias_ref,
                 cosq_ref, sinq_ref, cosk_ref, sink_ref, rotq_ref, rotk_ref,
                 ln1_ref, wqkv_ref, bqkv_ref, wo_ref, ln2_ref, wgu_ref, wd_ref,
                 fln_ref, wlm_ref, lbl_ref,
                 logits_ref, nll_ref):
    """One grid step == one batch element. Whole transformer stack + LM head +
    per-token CE run in-kernel; the residual stays in vregs/VMEM."""
    h = h_ref[0]                                  # (S, H)   f32 embeddings
    bias = bias_ref[0]                            # (S, S)   causal+padding, f32
    cos_q = cosq_ref[...]                         # (S, Q_DIM)  scale folded in
    sin_q = sinq_ref[...]
    cos_k = cosk_ref[...]                         # (S, KV_DIM)
    sin_k = sink_ref[...]
    rot_q = rotq_ref[...]                         # (Q_DIM, Q_DIM) block-diag perm
    rot_k = rotk_ref[...]                         # (KV_DIM, KV_DIM)

    D = HEAD_DIM

    for l in range(N_LAYERS):                     # static unroll: weights VMEM-resident
        # ---- attention: RMSNorm -> fused QKV (bf16 MXU) -> slab RoPE -> SDPA ----
        xn = _rms(h, ln1_ref[l])
        qkv = (jnp.dot(xn.astype(jnp.bfloat16), wqkv_ref[l],
                       preferred_element_type=jnp.float32)
               + bqkv_ref[l])                     # (S, 128) lane-dense

        q = qkv[:, :Q_DIM]                        # (S, 64)
        k = qkv[:, Q_DIM:Q_DIM + KV_DIM]          # (S, 32)
        v = qkv[:, Q_DIM + KV_DIM:]               # (S, 32)

        # slab RoPE: rotate-half as one block-diagonal signed-permutation matmul
        # (1/sqrt(D) already folded into cos_q / sin_q)
        q = q * cos_q + jnp.dot(q, rot_q, preferred_element_type=jnp.float32) * sin_q
        k = k * cos_k + jnp.dot(k, rot_k, preferred_element_type=jnp.float32) * sin_k

        ctx = []
        for hh in range(N_HEADS):                 # GQA: heads attend independently
            g = hh // GROUP
            qh = q[:, hh * D:(hh + 1) * D]
            kh = k[:, g * D:(g + 1) * D]
            vh = v[:, g * D:(g + 1) * D]
            s = jax.lax.dot_general(qh, kh, (((1,), (1,)), ((), ())),
                                    preferred_element_type=jnp.float32) + bias
            s = s - jnp.max(s, axis=-1, keepdims=True)
            p = jnp.exp(s)                        # f32 EUP/VPU math (v5e-safe)
            p = p / jnp.sum(p, axis=-1, keepdims=True)
            ctx.append(jnp.dot(p, vh, preferred_element_type=jnp.float32))
        ctx = jnp.concatenate(ctx, axis=-1)       # (S, Q_DIM) context slab
        # single o-projection matmul (wo stored as (Q_DIM, H) at init)
        h = h + jnp.dot(ctx.astype(jnp.bfloat16), wo_ref[l],
                        preferred_element_type=jnp.float32)

        # ---- MLP: RMSNorm -> fused gate|up -> SiLU*up (f32) -> down ----
        xn2 = _rms(h, ln2_ref[l])
        gu = jnp.dot(xn2.astype(jnp.bfloat16), wgu_ref[l],
                     preferred_element_type=jnp.float32)   # (S, 2I)
        g_act = gu[:, :INTERMEDIATE]
        u = gu[:, INTERMEDIATE:]
        act = g_act * jax.nn.sigmoid(g_act) * u
        h = h + jnp.dot(act.astype(jnp.bfloat16), wd_ref[l],
                        preferred_element_type=jnp.float32)

    # ---- epilogue: final RMSNorm + tied LM head (lane-dense V=128 output) ----
    xf = _rms(h, fln_ref[...])
    logits = jnp.dot(xf.astype(jnp.bfloat16), wlm_ref[...],
                     preferred_element_type=jnp.float32)    # (S, V)
    logits_ref[0] = logits

    # ---- per-token CE vs pre-shifted labels (no one-hot; ignore done in glue) ----
    lbl = lbl_ref[0]                                        # (S, 1) int32
    m = jnp.max(logits, axis=-1, keepdims=True)
    lse = m + jnp.log(jnp.sum(jnp.exp(logits - m), axis=-1, keepdims=True))
    col = jax.lax.broadcasted_iota(jnp.int32, logits.shape, 1)
    tgt = jnp.sum(jnp.where(col == lbl, logits, 0.0), axis=-1, keepdims=True)
    nll_ref[0] = lse - tgt                                  # (S, 1)


def qwen_fused_forward(h0, params, bias, cos_q, sin_q, cos_k, sin_k,
                       rot_q, rot_k, labels_shifted):
    B, S, H = h0.shape
    V = params["lm_head"].shape[1]
    full = lambda *shape: (lambda b: tuple(0 for _ in shape))
    return pl.pallas_call(
        _qwen_kernel,
        out_shape=(jax.ShapeDtypeStruct((B, S, V), jnp.float32),
                   jax.ShapeDtypeStruct((B, S, 1), jnp.float32)),
        grid=(B,),
        in_specs=[
            pl.BlockSpec((1, S, H), lambda b: (b, 0, 0)),                      # h0
            pl.BlockSpec((1, S, S), lambda b: (b, 0, 0)),                      # bias
            pl.BlockSpec((S, Q_DIM), lambda b: (0, 0)),                        # cos_q
            pl.BlockSpec((S, Q_DIM), lambda b: (0, 0)),                        # sin_q
            pl.BlockSpec((S, KV_DIM), lambda b: (0, 0)),                       # cos_k
            pl.BlockSpec((S, KV_DIM), lambda b: (0, 0)),                       # sin_k
            pl.BlockSpec((Q_DIM, Q_DIM), lambda b: (0, 0)),                    # rot_q
            pl.BlockSpec((KV_DIM, KV_DIM), lambda b: (0, 0)),                  # rot_k
            pl.BlockSpec((N_LAYERS, 1, H), lambda b: (0, 0, 0)),               # ln1
            pl.BlockSpec((N_LAYERS, H, QKV_DIM), lambda b: (0, 0, 0)),         # wqkv
            pl.BlockSpec((N_LAYERS, 1, QKV_DIM), lambda b: (0, 0, 0)),         # bqkv
            pl.BlockSpec((N_LAYERS, Q_DIM, H), lambda b: (0, 0, 0)),           # wo
            pl.BlockSpec((N_LAYERS, 1, H), lambda b: (0, 0, 0)),               # ln2
            pl.BlockSpec((N_LAYERS, H, 2 * INTERMEDIATE), lambda b: (0, 0, 0)),# wgu
            pl.BlockSpec((N_LAYERS, INTERMEDIATE, H), lambda b: (0, 0, 0)),    # wd
            pl.BlockSpec((1, H), lambda b: (0, 0)),                            # final_ln
            pl.BlockSpec((H, V), lambda b: (0, 0)),                            # lm_head
            pl.BlockSpec((1, S, 1), lambda b: (b, 0, 0)),                      # labels
        ],
        out_specs=[pl.BlockSpec((1, S, V), lambda b: (b, 0, 0)),
                   pl.BlockSpec((1, S, 1), lambda b: (b, 0, 0))],
        compiler_params=pltpu.CompilerParams(dimension_semantics=("parallel",)),
    )(h0, bias, cos_q, sin_q, cos_k, sin_k, rot_q, rot_k,
      params["ln1"], params["wqkv"], params["bqkv"], params["wo"],
      params["ln2"], params["wgu"], params["wd"],
      params["final_ln"], params["lm_head"], labels_shifted)


# ----------------------------- constants / params (glue) --------------------
def rope_cos_sin(seq_len, dim, theta=ROPE_THETA):
    inv_freq = 1.0 / (theta ** (jnp.arange(0, dim, 2, dtype=jnp.float32) / dim))
    t = jnp.arange(seq_len, dtype=jnp.float32)
    freqs = jnp.outer(t, inv_freq)                      # (S, D/2)
    emb = jnp.concatenate([freqs, freqs], axis=-1)      # (S, D)
    return jnp.cos(emb), jnp.sin(emb)


def rotate_half_matrix(d):
    """R s.t. x @ R == rotate_half(x) for a single head of width d."""
    i = jnp.arange(d)[:, None]
    j = jnp.arange(d)[None, :]
    return (jnp.where(i == j + d // 2, -1.0, 0.0)
            + jnp.where(i + d // 2 == j, 1.0, 0.0)).astype(jnp.float32)


def init_params(key):
    def nrm(k, shape, scale=0.02, dtype=jnp.float32):
        return (scale * jax.random.normal(k, shape)).astype(dtype)

    keys = jax.random.split(key, 1 + 5 * N_LAYERS)
    embed = nrm(keys[0], (VOCAB, HIDDEN))
    wqkv, bqkv, wo, wgu, wd = [], [], [], [], []
    for li in range(N_LAYERS):
        k0, k1, k2, k3, k4 = keys[1 + 5 * li: 1 + 5 * (li + 1)]
        wqkv.append(nrm(k0, (HIDDEN, QKV_DIM), dtype=jnp.bfloat16))
        bqkv.append(nrm(k1, (1, QKV_DIM)))
        wo.append(nrm(k2, (Q_DIM, HIDDEN), dtype=jnp.bfloat16))   # (Q_DIM, H) slab
        wgu.append(nrm(k3, (HIDDEN, 2 * INTERMEDIATE), dtype=jnp.bfloat16))
        wd.append(nrm(k4, (INTERMEDIATE, HIDDEN), dtype=jnp.bfloat16))
    return {
        "embed": embed,                                  # [V, H] f32 (token gather)
        "lm_head": embed.T.astype(jnp.bfloat16),         # tied head, transposed ONCE
        "final_ln": jnp.ones((1, HIDDEN), jnp.float32),
        "ln1": jnp.ones((N_LAYERS, 1, HIDDEN), jnp.float32),
        "ln2": jnp.ones((N_LAYERS, 1, HIDDEN), jnp.float32),
        "wqkv": jnp.stack(wqkv),
        "bqkv": jnp.stack(bqkv),
        "wo": jnp.stack(wo),
        "wgu": jnp.stack(wgu),
        "wd": jnp.stack(wd),
    }


def qwen_forward(params, input_ids, attention_mask=None, labels=None):
    """Returns (logits [B,S,V], loss-or-None) — mirrors CausalLMOutputWithPast."""
    B, S = input_ids.shape
    # TODO(synk): token-embedding gather stays in XLA glue (dynamic row gather
    # has no clean tiny-Pallas equivalent at this size).
    h0 = params["embed"][input_ids]                      # (B, S, H) f32

    # constant side-tables, built once per trace (hoisted out of the kernel body)
    cos, sin = rope_cos_sin(S, HEAD_DIM)                 # (S, D)
    scale = 1.0 / (HEAD_DIM ** 0.5)
    cos_q = jnp.tile(cos, (1, N_HEADS)) * scale          # scale folded into RoPE(q)
    sin_q = jnp.tile(sin, (1, N_HEADS)) * scale
    cos_k = jnp.tile(cos, (1, N_KV_HEADS))
    sin_k = jnp.tile(sin, (1, N_KV_HEADS))
    r = rotate_half_matrix(HEAD_DIM)
    rot_q = jnp.kron(jnp.eye(N_HEADS, dtype=jnp.float32), r)      # (Q_DIM, Q_DIM)
    rot_k = jnp.kron(jnp.eye(N_KV_HEADS, dtype=jnp.float32), r)   # (KV_DIM, KV_DIM)

    if attention_mask is None:
        attention_mask = jnp.ones((B, S), jnp.float32)
    amask = attention_mask.astype(jnp.float32)
    row = jnp.arange(S)[:, None]
    col = jnp.arange(S)[None, :]
    keep = (col <= row)[None, :, :] & (amask[:, None, :] > 0.5)
    bias = jnp.where(keep, 0.0, -1e9).astype(jnp.float32)         # (B, S, S)

    # pre-shifted labels: position t predicts labels[t+1]; last position ignored
    if labels is not None:
        lbl_sh = jnp.concatenate(
            [labels[:, 1:].astype(jnp.int32),
             jnp.full((B, 1), -100, jnp.int32)], axis=1)
    else:
        lbl_sh = jnp.full((B, S), -100, jnp.int32)
    lbl_in = lbl_sh.reshape(B, S, 1)

    logits, nll = qwen_fused_forward(h0, params, bias, cos_q, sin_q, cos_k, sin_k,
                                     rot_q, rot_k, lbl_in)

    loss = None
    if labels is not None:
        valid = (lbl_sh != -100).astype(jnp.float32)               # (B, S)
        loss = jnp.sum(nll[:, :, 0] * valid) / jnp.maximum(jnp.sum(valid), 1.0)
    return logits, loss


# ----------------------------- main ------------------------------------------
if __name__ == "__main__":
    key = jax.random.PRNGKey(0)
    pkey, ikey = jax.random.split(key)
    params = init_params(pkey)

    input_ids = jax.random.randint(ikey, (BATCH, SEQ), 0, VOCAB, dtype=jnp.int32)
    attention_mask = jnp.ones((BATCH, SEQ), jnp.int32)
    labels = input_ids  # standard causal-LM labels

    fwd = jax.jit(qwen_forward)
    logits, loss = fwd(params, input_ids, attention_mask, labels)
    logits = jax.block_until_ready(logits)
    loss = jax.block_until_ready(loss)

    assert logits.shape == (BATCH, SEQ, VOCAB)
    assert bool(jnp.isfinite(loss))
    assert bool(jnp.all(jnp.isfinite(logits)))
    # TODO(synk): `generate` (autoregressive decode loop with KV cache) is not
    # reproduced here; only the forward pass (logits + loss) is implemented.
    print("KERNEL_OK")
</pallas_src>

<mosaic_0001>
module attributes {stable_mosaic.version = 11 : i64} {
  func.func @_qwen_kernel(%arg0: i32, %arg1: memref<1x8x64xf32, #tpu.memory_space<vmem>>, %arg2: memref<1x8x8xf32, #tpu.memory_space<vmem>>, %arg3: memref<8x64xf32, #tpu.memory_space<vmem>>, %arg4: memref<8x64xf32, #tpu.memory_space<vmem>>, %arg5: memref<8x32xf32, #tpu.memory_space<vmem>>, %arg6: memref<8x32xf32, #tpu.memory_space<vmem>>, %arg7: memref<64x64xf32, #tpu.memory_space<vmem>>, %arg8: memref<32x32xf32, #tpu.memory_space<vmem>>, %arg9: memref<2x1x64xf32, #tpu.memory_space<vmem>>, %arg10: memref<2x64x128xbf16, #tpu.memory_space<vmem>>, %arg11: memref<2x1x128xf32, #tpu.memory_space<vmem>>, %arg12: memref<2x64x64xbf16, #tpu.memory_space<vmem>>, %arg13: memref<2x1x64xf32, #tpu.memory_space<vmem>>, %arg14: memref<2x64x256xbf16, #tpu.memory_space<vmem>>, %arg15: memref<2x128x64xbf16, #tpu.memory_space<vmem>>, %arg16: memref<1x64xf32, #tpu.memory_space<vmem>>, %arg17: memref<64x128xbf16, #tpu.memory_space<vmem>>, %arg18: memref<1x8x1xi32, #tpu.memory_space<vmem>>, %arg19: memref<1x8x128xf32, #tpu.memory_space<vmem>>, %arg20: memref<1x8x1xf32, #tpu.memory_space<vmem>>) attributes {dimension_semantics = [#tpu.dimension_semantics<parallel>], iteration_bounds = array<i64: 2>, scalar_prefetch = 0 : i64, scratch_operands = 0 : i64, tpu.core_type = #tpu.core_type<tc>, window_params = [{transform_indices = @transform_0, window_bounds = array<i64: 1, 8, 64>}, {transform_indices = @transform_1, window_bounds = array<i64: 1, 8, 8>}, {pipeline_mode = #tpu.pipeline_mode<synchronous>, transform_indices = @transform_2, window_bounds = array<i64: 8, 64>}, {pipeline_mode = #tpu.pipeline_mode<synchronous>, transform_indices = @transform_3, window_bounds = array<i64: 8, 64>}, {pipeline_mode = #tpu.pipeline_mode<synchronous>, transform_indices = @transform_4, window_bounds = array<i64: 8, 32>}, {pipeline_mode = #tpu.pipeline_mode<synchronous>, transform_indices = @transform_5, window_bounds = array<i64: 8, 32>}, {pipeline_mode = #tpu.pipeline_mode<synchronous>, transform_indices = @transform_6, window_bounds = array<i64: 64, 64>}, {pipeline_mode = #tpu.pipeline_mode<synchronous>, transform_indices = @transform_7, window_bounds = array<i64: 32, 32>}, {pipeline_mode = #tpu.pipeline_mode<synchronous>, transform_indices = @transform_8, window_bounds = array<i64: 2, 1, 64>}, {pipeline_mode = #tpu.pipeline_mode<synchronous>, transform_indices = @transform_9, window_bounds = array<i64: 2, 64, 128>}, {pipeline_mode = #tpu.pipeline_mode<synchronous>, transform_indices = @transform_10, window_bounds = array<i64: 2, 1, 128>}, {pipeline_mode = #tpu.pipeline_mode<synchronous>, transform_indices = @transform_11, window_bounds = array<i64: 2, 64, 64>}, {pipeline_mode = #tpu.pipeline_mode<synchronous>, transform_indices = @transform_12, window_bounds = array<i64: 2, 1, 64>}, {pipeline_mode = #tpu.pipeline_mode<synchronous>, transform_indices = @transform_13, window_bounds = array<i64: 2, 64, 256>}, {pipeline_mode = #tpu.pipeline_mode<synchronous>, transform_indices = @transform_14, window_bounds = array<i64: 2, 128, 64>}, {pipeline_mode = #tpu.pipeline_mode<synchronous>, transform_indices = @transform_15, window_bounds = array<i64: 1, 64>}, {pipeline_mode = #tpu.pipeline_mode<synchronous>, transform_indices = @transform_16, window_bounds = array<i64: 64, 128>}, {transform_indices = @transform_17, window_bounds = array<i64: 1, 8, 1>}, {transform_indices = @transform_18, window_bounds = array<i64: 1, 8, 128>}, {transform_indices = @transform_19, window_bounds = array<i64: 1, 8, 1>}]} {
    %c0 = arith.constant 0 : index
    %c0_0 = arith.constant 0 : index
    %c0_1 = arith.constant 0 : index
    %0 = vector.load %arg1[%c0, %c0_0, %c0_1] : memref<1x8x64xf32, #tpu.memory_space<vmem>>, vector<1x8x64xf32>
    %1 = vector.shape_cast %0 : vector<1x8x64xf32> to vector<8x64xf32>
    %c0_2 = arith.constant 0 : index
    %c0_3 = arith.constant 0 : index
    %c0_4 = arith.constant 0 : index
    %2 = vector.load %arg2[%c0_2, %c0_3, %c0_4] : memref<1x8x8xf32, #tpu.memory_space<vmem>>, vector<1x8x8xf32>
    %3 = vector.shape_cast %2 : vector<1x8x8xf32> to vector<8x8xf32>
    %c0_5 = arith.constant 0 : index
    %c0_6 = arith.constant 0 : index
    %4 = vector.load %arg3[%c0_5, %c0_6] : memref<8x64xf32, #tpu.memory_space<vmem>>, vector<8x64xf32>
    %c0_7 = arith.constant 0 : index
    %c0_8 = arith.constant 0 : index
    %5 = vector.load %arg4[%c0_7, %c0_8] : memref<8x64xf32, #tpu.memory_space<vmem>>, vector<8x64xf32>
    %c0_9 = arith.constant 0 : index
    %c0_10 = arith.constant 0 : index
    %6 = vector.load %arg5[%c0_9, %c0_10] : memref<8x32xf32, #tpu.memory_space<vmem>>, vector<8x32xf32>
    %c0_11 = arith.constant 0 : index
    %c0_12 = arith.constant 0 : index
    %7 = vector.load %arg6[%c0_11, %c0_12] : memref<8x32xf32, #tpu.memory_space<vmem>>, vector<8x32xf32>
    %c0_13 = arith.constant 0 : index
    %c0_14 = arith.constant 0 : index
    %8 = vector.load %arg7[%c0_13, %c0_14] : memref<64x64xf32, #tpu.memory_space<vmem>>, vector<64x64xf32>
    %c0_15 = arith.constant 0 : index
    %c0_16 = arith.constant 0 : index
    %9 = vector.load %arg8[%c0_15, %c0_16] : memref<32x32xf32, #tpu.memory_space<vmem>>, vector<32x32xf32>
    %c0_17 = arith.constant 0 : index
    %c0_18 = arith.constant 0 : index
    %c0_19 = arith.constant 0 : index
    %10 = vector.load %arg9[%c0_17, %c0_18, %c0_19] : memref<2x1x64xf32, #tpu.memory_space<vmem>>, vector<1x1x64xf32>
    %11 = vector.shape_cast %10 : vector<1x1x64xf32> to vector<1x64xf32>
    %12 = arith.mulf %1, %1 : vector<8x64xf32>
    %cst = arith.constant dense<0.000000e+00> : vector<8xf32>
    %13 = vector.multi_reduction <add>, %12, %cst [1] : vector<8x64xf32> to vector<8xf32>
    %14 = vector.shape_cast %13 : vector<8xf32> to vector<8x1xf32>
    %cst_20 = arith.constant 6.400000e+01 : f32
    %15 = vector.broadcast %cst_20 : f32 to vector<8x1xf32>
    %16 = arith.divf %14, %15 : vector<8x1xf32>
    %cst_21 = arith.constant 9.99999997E-7 : f32
    %17 = vector.broadcast %cst_21 : f32 to vector<8x1xf32>
    %18 = arith.addf %16, %17 : vector<8x1xf32>
    %19 = math.rsqrt %18 : vector<8x1xf32>
    %20 = vector.broadcast %19 : vector<8x1xf32> to vector<8x64xf32>
    %21 = arith.mulf %1, %20 : vector<8x64xf32>
    %22 = vector.broadcast %11 : vector<1x64xf32> to vector<8x64xf32>
    %23 = arith.mulf %21, %22 : vector<8x64xf32>
    %24 = arith.truncf %23 : vector<8x64xf32> to vector<8x64xbf16>
    %c0_22 = arith.constant 0 : index
    %c0_23 = arith.constant 0 : index
    %c0_24 = arith.constant 0 : index
    %25 = vector.load %arg10[%c0_22, %c0_23, %c0_24] : memref<2x64x128xbf16, #tpu.memory_space<vmem>>, vector<1x64x128xbf16>
    %26 = vector.shape_cast %25 : vector<1x64x128xbf16> to vector<64x128xbf16>
    %cst_25 = arith.constant dense<0.000000e+00> : vector<8x128xf32>
    %27 = tpu.matmul %24, %26, %cst_25 {dimension_numbers = #tpu.dot_dimension_numbers<[1], [0], [0], [1], [0, 0, 1, 1], [], []>} : vector<8x64xbf16>, vector<64x128xbf16>, vector<8x128xf32> -> vector<8x128xf32>
    %c0_26 = arith.constant 0 : index
    %c0_27 = arith.constant 0 : index
    %c0_28 = arith.constant 0 : index
    %28 = vector.load %arg11[%c0_26, %c0_27, %c0_28] : memref<2x1x128xf32, #tpu.memory_space<vmem>>, vector<1x1x128xf32>
    %29 = vector.shape_cast %28 : vector<1x1x128xf32> to vector<1x128xf32>
    %30 = vector.broadcast %29 : vector<1x128xf32> to vector<8x128xf32>
    %31 = arith.addf %27, %30 : vector<8x128xf32>
    %32 = vector.extract_strided_slice %31 {offsets = [0, 0], sizes = [8, 64], strides = [1, 1]} : vector<8x128xf32> to vector<8x64xf32>
    %33 = vector.extract_strided_slice %31 {offsets = [0, 64], sizes = [8, 32], strides = [1, 1]} : vector<8x128xf32> to vector<8x32xf32>
    %34 = vector.extract_strided_slice %31 {offsets = [0, 96], sizes = [8, 32], strides = [1, 1]} : vector<8x128xf32> to vector<8x32xf32>
    %35 = arith.mulf %32, %4 : vector<8x64xf32>
    %cst_29 = arith.constant dense<0.000000e+00> : vector<8x64xf32>
    %36 = tpu.matmul %32, %8, %cst_29 {dimension_numbers = #tpu.dot_dimension_numbers<[1], [0], [0], [1], [0, 0, 1, 1], [], []>} : vector<8x64xf32>, vector<64x64xf32>, vector<8x64xf32> -> vector<8x64xf32>
    %37 = arith.mulf %36, %5 : vector<8x64xf32>
    %38 = arith.addf %35, %37 : vector<8x64xf32>
    %39 = arith.mulf %33, %6 : vector<8x32xf32>
    %cst_30 = arith.constant dense<0.000000e+00> : vector<8x32xf32>
    %40 = tpu.matmul %33, %9, %cst_30 {dimension_numbers = #tpu.dot_dimension_numbers<[1], [0], [0], [1], [0, 0, 1, 1], [], []>} : vector<8x32xf32>, vector<32x32xf32>, vector<8x32xf32> -> vector<8x32xf32>
    %41 = arith.mulf %40, %7 : vector<8x32xf32>
    %42 = arith.addf %39, %41 : vector<8x32xf32>
    %43 = vector.extract_strided_slice %38 {offsets = [0, 0], sizes = [8, 16], strides = [1, 1]} : vector<8x64xf32> to vector<8x16xf32>
    %44 = vector.extract_strided_slice %42 {offsets = [0, 0], sizes = [8, 16], strides = [1, 1]} : vector<8x32xf32> to vector<8x16xf32>
    %45 = vector.extract_strided_slice %34 {offsets = [0, 0], sizes = [8, 16], strides = [1, 1]} : vector<8x32xf32> to vector<8x16xf32>
    %cst_31 = arith.constant dense<0.000000e+00> : vector<8x8xf32>
    %46 = tpu.matmul %43, %44, %cst_31 {dimension_numbers = #tpu.dot_dimension_numbers<[1], [1], [0], [0], [0, 0, 1, 0], [], []>} : vector<8x16xf32>, vector<8x16xf32>, vector<8x8xf32> -> vector<8x8xf32>
    %47 = arith.addf %46, %3 : vector<8x8xf32>
    %cst_32 = arith.constant dense<0xFF800000> : vector<8xf32>
    %48 = vector.multi_reduction <maximumf>, %47, %cst_32 [1] : vector<8x8xf32> to vector<8xf32>
    %49 = vector.shape_cast %48 : vector<8xf32> to vector<8x1xf32>
    %50 = vector.broadcast %49 : vector<8x1xf32> to vector<8x8xf32>
    %51 = arith.subf %47, %50 : vector<8x8xf32>
    %52 = math.exp %51 : vector<8x8xf32>
    %cst_33 = arith.constant dense<0.000000e+00> : vector<8xf32>
    %53 = vector.multi_reduction <add>, %52, %cst_33 [1] : vector<8x8xf32> to vector<8xf32>
    %54 = vector.shape_cast %53 : vector<8xf32> to vector<8x1xf32>
    %55 = vector.broadcast %54 : vector<8x1xf32> to vector<8x8xf32>
    %56 = arith.divf %52, %55 : vector<8x8xf32>
    %cst_34 = arith.constant dense<0.000000e+00> : vector<8x16xf32>
    %57 = tpu.matmul %56, %45, %cst_34 {dimension_numbers = #tpu.dot_dimension_numbers<[1], [0], [0], [1], [0, 0, 1, 1], [], []>} : vector<8x8xf32>, vector<8x16xf32>, vector<8x16xf32> -> vector<8x16xf32>
    %58 = vector.extract_strided_slice %38 {offsets = [0, 16], sizes = [8, 16], strides = [1, 1]} : vector<8x64xf32> to vector<8x16xf32>
    %59 = vector.extract_strided_slice %42 {offsets = [0, 0], sizes = [8, 16], strides = [1, 1]} : vector<8x32xf32> to vector<8x16xf32>
    %60 = vector.extract_strided_slice %34 {offsets = [0, 0], sizes = [8, 16], strides = [1, 1]} : vector<8x32xf32> to vector<8x16xf32>
    %cst_35 = arith.constant dense<0.000000e+00> : vector<8x8xf32>
    %61 = tpu.matmul %58, %59, %cst_35 {dimension_numbers = #tpu.dot_dimension_numbers<[1], [1], [0], [0], [0, 0, 1, 0], [], []>} : vector<8x16xf32>, vector<8x16xf32>, vector<8x8xf32> -> vector<8x8xf32>
    %62 = arith.addf %61, %3 : vector<8x8xf32>
    %cst_36 = arith.constant dense<0xFF800000> : vector<8xf32>
    %63 = vector.multi_reduction <maximumf>, %62, %cst_36 [1] : vector<8x8xf32> to vector<8xf32>
    %64 = vector.shape_cast %63 : vector<8xf32> to vector<8x1xf32>
    %65 = vector.broadcast %64 : vector<8x1xf32> to vector<8x8xf32>
    %66 = arith.subf %62, %65 : vector<8x8xf32>
    %67 = math.exp %66 : vector<8x8xf32>
    %cst_37 = arith.constant dense<0.000000e+00> : vector<8xf32>
    %68 = vector.multi_reduction <add>, %67, %cst_37 [1] : vector<8x8xf32> to vector<8xf32>
    %69 = vector.shape_cast %68 : vector<8xf32> to vector<8x1xf32>
    %70 = vector.broadcast %69 : vector<8x1xf32> to vector<8x8xf32>
    %71 = arith.divf %67, %70 : vector<8x8xf32>
    %cst_38 = arith.constant dense<0.000000e+00> : vector<8x16xf32>
    %72 = tpu.matmul %71, %60, %cst_38 {dimension_numbers = #tpu.dot_dimension_numbers<[1], [0], [0], [1], [0, 0, 1, 1], [], []>} : vector<8x8xf32>, vector<8x16xf32>, vector<8x16xf32> -> vector<8x16xf32>
    %73 = vector.extract_strided_slice %38 {offsets = [0, 32], sizes = [8, 16], strides = [1, 1]} : vector<8x64xf32> to vector<8x16xf32>
    %74 = vector.extract_strided_slice %42 {offsets = [0, 16], sizes = [8, 16], strides = [1, 1]} : vector<8x32xf32> to vector<8x16xf32>
    %75 = vector.extract_strided_slice %34 {offsets = [0, 16], sizes = [8, 16], strides = [1, 1]} : vector<8x32xf32> to vector<8x16xf32>
    %cst_39 = arith.constant dense<0.000000e+00> : vector<8x8xf32>
    %76 = tpu.matmul %73, %74, %cst_39 {dimension_numbers = #tpu.dot_dimension_numbers<[1], [1], [0], [0], [0, 0, 1, 0], [], []>} : vector<8x16xf32>, vector<8x16xf32>, vector<8x8xf32> -> vector<8x8xf32>
    %77 = arith.addf %76, %3 : vector<8x8xf32>
    %cst_40 = arith.constant dense<0xFF800000> : vector<8xf32>
    %78 = vector.multi_reduction <maximumf>, %77, %cst_40 [1] : vector<8x8xf32> to vector<8xf32>
    %79 = vector.shape_cast %78 : vector<8xf32> to vector<8x1xf32>
    %80 = vector.broadcast %79 : vector<8x1xf32> to vector<8x8xf32>
    %81 = arith.subf %77, %80 : vector<8x8xf32>
    %82 = math.exp %81 : vector<8x8xf32>
    %cst_41 = arith.constant dense<0.000000e+00> : vector<8xf32>
    %83 = vector.multi_reduction <add>, %82, %cst_41 [1] : vector<8x8xf32> to vector<8xf32>
    %84 = vector.shape_cast %83 : vector<8xf32> to vector<8x1xf32>
    %85 = vector.broadcast %84 : vector<8x1xf32> to vector<8x8xf32>
    %86 = arith.divf %82, %85 : vector<8x8xf32>
    %cst_42 = arith.constant dense<0.000000e+00> : vector<8x16xf32>
    %87 = tpu.matmul %86, %75, %cst_42 {dimension_numbers = #tpu.dot_dimension_numbers<[1], [0], [0], [1], [0, 0, 1, 1], [], []>} : vector<8x8xf32>, vector<8x16xf32>, vector<8x16xf32> -> vector<8x16xf32>
    %88 = vector.extract_strided_slice %38 {offsets = [0, 48], sizes = [8, 16], strides = [1, 1]} : vector<8x64xf32> to vector<8x16xf32>
    %89 = vector.extract_strided_slice %42 {offsets = [0, 16], sizes = [8, 16], strides = [1, 1]} : vector<8x32xf32> to vector<8x16xf32>
    %90 = vector.extract_strided_slice %34 {offsets = [0, 16], sizes = [8, 16], strides = [1, 1]} : vector<8x32xf32> to vector<8x16xf32>
    %cst_43 = arith.constant dense<0.000000e+00> : vector<8x8xf32>
    %91 = tpu.matmul %88, %89, %cst_43 {dimension_numbers = #tpu.dot_dimension_numbers<[1], [1], [0], [0], [0, 0, 1, 0], [], []>} : vector<8x16xf32>, vector<8x16xf32>, vector<8x8xf32> -> vector<8x8xf32>
    %92 = arith.addf %91, %3 : vector<8x8xf32>
    %cst_44 = arith.constant dense<0xFF800000> : vector<8xf32>
    %93 = vector.multi_reduction <maximumf>, %92, %cst_44 [1] : vector<8x8xf32> to vector<8xf32>
    %94 = vector.shape_cast %93 : vector<8xf32> to vector<8x1xf32>
    %95 = vector.broadcast %94 : vector<8x1xf32> to vector<8x8xf32>
    %96 = arith.subf %92, %95 : vector<8x8xf32>
    %97 = math.exp %96 : vector<8x8xf32>
    %cst_45 = arith.constant dense<0.000000e+00> : vector<8xf32>
    %98 = vector.multi_reduction <add>, %97, %cst_45 [1] : vector<8x8xf32> to vector<8xf32>
    %99 = vector.shape_cast %98 : vector<8xf32> to vector<8x1xf32>
    %100 = vector.broadcast %99 : vector<8x1xf32> to vector<8x8xf32>
    %101 = arith.divf %97, %100 : vector<8x8xf32>
    %cst_46 = arith.constant dense<0.000000e+00> : vector<8x16xf32>
    %102 = tpu.matmul %101, %90, %cst_46 {dimension_numbers = #tpu.dot_dimension_numbers<[1], [0], [0], [1], [0, 0, 1, 1], [], []>} : vector<8x8xf32>, vector<8x16xf32>, vector<8x16xf32> -> vector<8x16xf32>
    %103 = tpu.concatenate %57, %72, %87, %102 in 1 : vector<8x16xf32>, vector<8x16xf32>, vector<8x16xf32>, vector<8x16xf32> -> vector<8x64xf32>
    %104 = arith.truncf %103 : vector<8x64xf32> to vector<8x64xbf16>
    %c0_47 = arith.constant 0 : index
    %c0_48 = arith.constant 0 : index
    %c0_49 = arith.constant 0 : index
    %105 = vector.load %arg12[%c0_47, %c0_48, %c0_49] : memref<2x64x64xbf16, #tpu.memory_space<vmem>>, vector<1x64x64xbf16>
    %106 = vector.shape_cast %105 : vector<1x64x64xbf16> to vector<64x64xbf16>
    %cst_50 = arith.constant dense<0.000000e+00> : vector<8x64xf32>
    %107 = tpu.matmul %104, %106, %cst_50 {dimension_numbers = #tpu.dot_dimension_numbers<[1], [0], [0], [1], [0, 0, 1, 1], [], []>} : vector<8x64xbf16>, vector<64x64xbf16>, vector<8x64xf32> -> vector<8x64xf32>
    %108 = arith.addf %1, %107 : vector<8x64xf32>
    %c0_51 = arith.constant 0 : index
    %c0_52 = arith.constant 0 : index
    %c0_53 = arith.constant 0 : index
    %109 = vector.load %arg13[%c0_51, %c0_52, %c0_53] : memref<2x1x64xf32, #tpu.memory_space<vmem>>, vector<1x1x64xf32>
    %110 = vector.shape_cast %109 : vector<1x1x64xf32> to vector<1x64xf32>
    %111 = arith.mulf %108, %108 : vector<8x64xf32>
    %cst_54 = arith.constant dense<0.000000e+00> : vector<8xf32>
    %112 = vector.multi_reduction <add>, %111, %cst_54 [1] : vector<8x64xf32> to vector<8xf32>
    %113 = vector.shape_cast %112 : vector<8xf32> to vector<8x1xf32>
    %cst_55 = arith.constant 6.400000e+01 : f32
    %114 = vector.broadcast %cst_55 : f32 to vector<8x1xf32>
    %115 = arith.divf %113, %114 : vector<8x1xf32>
    %cst_56 = arith.constant 9.99999997E-7 : f32
    %116 = vector.broadcast %cst_56 : f32 to vector<8x1xf32>
    %117 = arith.addf %115, %116 : vector<8x1xf32>
    %118 = math.rsqrt %117 : vector<8x1xf32>
    %119 = vector.broadcast %118 : vector<8x1xf32> to vector<8x64xf32>
    %120 = arith.mulf %108, %119 : vector<8x64xf32>
    %121 = vector.broadcast %110 : vector<1x64xf32> to vector<8x64xf32>
    %122 = arith.mulf %120, %121 : vector<8x64xf32>
    %123 = arith.truncf %122 : vector<8x64xf32> to vector<8x64xbf16>
    %c0_57 = arith.constant 0 : index
    %c0_58 = arith.constant 0 : index
    %c0_59 = arith.constant 0 : index
    %124 = vector.load %arg14[%c0_57, %c0_58, %c0_59] : memref<2x64x256xbf16, #tpu.memory_space<vmem>>, vector<1x64x256xbf16>
    %125 = vector.shape_cast %124 : vector<1x64x256xbf16> to vector<64x256xbf16>
    %cst_60 = arith.constant dense<0.000000e+00> : vector<8x256xf32>
    %126 = tpu.matmul %123, %125, %cst_60 {dimension_numbers = #tpu.dot_dimension_numbers<[1], [0], [0], [1], [0, 0, 1, 1], [], []>} : vector<8x64xbf16>, vector<64x256xbf16>, vector<8x256xf32> -> vector<8x256xf32>
    %127 = vector.extract_strided_slice %126 {offsets = [0, 0], sizes = [8, 128], strides = [1, 1]} : vector<8x256xf32> to vector<8x128xf32>
    %128 = vector.extract_strided_slice %126 {offsets = [0, 128], sizes = [8, 128], strides = [1, 1]} : vector<8x256xf32> to vector<8x128xf32>
    %129 = arith.negf %127 : vector<8x128xf32>
    %130 = math.exp %129 : vector<8x128xf32>
    %cst_61 = arith.constant 1.000000e+00 : f32
    %131 = vector.broadcast %cst_61 : f32 to vector<8x128xf32>
    %132 = arith.addf %131, %130 : vector<8x128xf32>
    %133 = arith.divf %131, %132 : vector<8x128xf32>
    %134 = arith.mulf %127, %133 : vector<8x128xf32>
    %135 = arith.mulf %134, %128 : vector<8x128xf32>
    %136 = arith.truncf %135 : vector<8x128xf32> to vector<8x128xbf16>
    %c0_62 = arith.constant 0 : index
    %c0_63 = arith.constant 0 : index
    %c0_64 = arith.constant 0 : index
    %137 = vector.load %arg15[%c0_62, %c0_63, %c0_64] : memref<2x128x64xbf16, #tpu.memory_space<vmem>>, vector<1x128x64xbf16>
    %138 = vector.shape_cast %137 : vector<1x128x64xbf16> to vector<128x64xbf16>
    %cst_65 = arith.constant dense<0.000000e+00> : vector<8x64xf32>
    %139 = tpu.matmul %136, %138, %cst_65 {dimension_numbers = #tpu.dot_dimension_numbers<[1], [0], [0], [1], [0, 0, 1, 1], [], []>} : vector<8x128xbf16>, vector<128x64xbf16>, vector<8x64xf32> -> vector<8x64xf32>
    %140 = arith.addf %108, %139 : vector<8x64xf32>
    %c1 = arith.constant 1 : index
    %c0_66 = arith.constant 0 : index
    %c0_67 = arith.constant 0 : index
    %141 = vector.load %arg9[%c1, %c0_66, %c0_67] : memref<2x1x64xf32, #tpu.memory_space<vmem>>, vector<1x1x64xf32>
    %142 = vector.shape_cast %141 : vector<1x1x64xf32> to vector<1x64xf32>
    %143 = arith.mulf %140, %140 : vector<8x64xf32>
    %cst_68 = arith.constant dense<0.000000e+00> : vector<8xf32>
    %144 = vector.multi_reduction <add>, %143, %cst_68 [1] : vector<8x64xf32> to vector<8xf32>
    %145 = vector.shape_cast %144 : vector<8xf32> to vector<8x1xf32>
    %cst_69 = arith.constant 6.400000e+01 : f32
    %146 = vector.broadcast %cst_69 : f32 to vector<8x1xf32>
    %147 = arith.divf %145, %146 : vector<8x1xf32>
    %cst_70 = arith.constant 9.99999997E-7 : f32
    %148 = vector.broadcast %cst_70 : f32 to vector<8x1xf32>
    %149 = arith.addf %147, %148 : vector<8x1xf32>
    %150 = math.rsqrt %149 : vector<8x1xf32>
    %151 = vector.broadcast %150 : vector<8x1xf32> to vector<8x64xf32>
    %152 = arith.mulf %140, %151 : vector<8x64xf32>
    %153 = vector.broadcast %142 : vector<1x64xf32> to vector<8x64xf32>
    %154 = arith.mulf %152, %153 : vector<8x64xf32>
    %155 = arith.truncf %154 : vector<8x64xf32> to vector<8x64xbf16>
    %c1_71 = arith.constant 1 : index
    %c0_72 = arith.constant 0 : index
    %c0_73 = arith.constant 0 : index
    %156 = vector.load %arg10[%c1_71, %c0_72, %c0_73] : memref<2x64x128xbf16, #tpu.memory_space<vmem>>, vector<1x64x128xbf16>
    %157 = vector.shape_cast %156 : vector<1x64x128xbf16> to vector<64x128xbf16>
    %cst_74 = arith.constant dense<0.000000e+00> : vector<8x128xf32>
    %158 = tpu.matmul %155, %157, %cst_74 {dimension_numbers = #tpu.dot_dimension_numbers<[1], [0], [0], [1], [0, 0, 1, 1], [], []>} : vector<8x64xbf16>, vector<64x128xbf16>, vector<8x128xf32> -> vector<8x128xf32>
    %c1_75 = arith.constant 1 : index
    %c0_76 = arith.constant 0 : index
    %c0_77 = arith.constant 0 : index
    %159 = vector.load %arg11[%c1_75, %c0_76, %c0_77] : memref<2x1x128xf32, #tpu.memory_space<vmem>>, vector<1x1x128xf32>
    %160 = vector.shape_cast %159 : vector<1x1x128xf32> to vector<1x128xf32>
    %161 = vector.broadcast %160 : vector<1x128xf32> to vector<8x128xf32>
    %162 = arith.addf %158, %161 : vector<8x128xf32>
    %163 = vector.extract_strided_slice %162 {offsets = [0, 0], sizes = [8, 64], strides = [1, 1]} : vector<8x128xf32> to vector<8x64xf32>
    %164 = vector.extract_strided_slice %162 {offsets = [0, 64], sizes = [8, 32], strides = [1, 1]} : vector<8x128xf32> to vector<8x32xf32>
    %165 = vector.extract_strided_slice %162 {offsets = [0, 96], sizes = [8, 32], strides = [1, 1]} : vector<8x128xf32> to vector<8x32xf32>
    %166 = arith.mulf %163, %4 : vector<8x64xf32>
    %cst_78 = arith.constant dense<0.000000e+00> : vector<8x64xf32>
    %167 = tpu.matmul %163, %8, %cst_78 {dimension_numbers = #tpu.dot_dimension_numbers<[1], [0], [0], [1], [0, 0, 1, 1], [], []>} : vector<8x64xf32>, vector<64x64xf32>, vector<8x64xf32> -> vector<8x64xf32>
    %168 = arith.mulf %167, %5 : vector<8x64xf32>
    %169 = arith.addf %166, %168 : vector<8x64xf32>
    %170 = arith.mulf %164, %6 : vector<8x32xf32>
    %cst_79 = arith.constant dense<0.000000e+00> : vector<8x32xf32>
    %171 = tpu.matmul %164, %9, %cst_79 {dimension_numbers = #tpu.dot_dimension_numbers<[1], [0], [0], [1], [0, 0, 1, 1], [], []>} : vector<8x32xf32>, vector<32x32xf32>, vector<8x32xf32> -> vector<8x32xf32>
    %172 = arith.mulf %171, %7 : vector<8x32xf32>
    %173 = arith.addf %170, %172 : vector<8x32xf32>
    %174 = vector.extract_strided_slice %169 {offsets = [0, 0], sizes = [8, 16], strides = [1, 1]} : vector<8x64xf32> to vector<8x16xf32>
    %175 = vector.extract_strided_slice %173 {offsets = [0, 0], sizes = [8, 16], strides = [1, 1]} : vector<8x32xf32> to vector<8x16xf32>
    %176 = vector.extract_strided_slice %165 {offsets = [0, 0], sizes = [8, 16], strides = [1, 1]} : vector<8x32xf32> to vector<8x16xf32>
    %cst_80 = arith.constant dense<0.000000e+00> : vector<8x8xf32>
    %177 = tpu.matmul %174, %175, %cst_80 {dimension_numbers = #tpu.dot_dimension_numbers<[1], [1], [0], [0], [0, 0, 1, 0], [], []>} : vector<8x16xf32>, vector<8x16xf32>, vector<8x8xf32> -> vector<8x8xf32>
    %178 = arith.addf %177, %3 : vector<8x8xf32>
    %cst_81 = arith.constant dense<0xFF800000> : vector<8xf32>
    %179 = vector.multi_reduction <maximumf>, %178, %cst_81 [1] : vector<8x8xf32> to vector<8xf32>
    %180 = vector.shape_cast %179 : vector<8xf32> to vector<8x1xf32>
    %181 = vector.broadcast %180 : vector<8x1xf32> to vector<8x8xf32>
    %182 = arith.subf %178, %181 : vector<8x8xf32>
    %183 = math.exp %182 : vector<8x8xf32>
    %cst_82 = arith.constant dense<0.000000e+00> : vector<8xf32>
    %184 = vector.multi_reduction <add>, %183, %cst_82 [1] : vector<8x8xf32> to vector<8xf32>
    %185 = vector.shape_cast %184 : vector<8xf32> to vector<8x1xf32>
    %186 = vector.broadcast %185 : vector<8x1xf32> to vector<8x8xf32>
    %187 = arith.divf %183, %186 : vector<8x8xf32>
    %cst_83 = arith.constant dense<0.000000e+00> : vector<8x16xf32>
    %188 = tpu.matmul %187, %176, %cst_83 {dimension_numbers = #tpu.dot_dimension_numbers<[1], [0], [0], [1], [0, 0, 1, 1], [], []>} : vector<8x8xf32>, vector<8x16xf32>, vector<8x16xf32> -> vector<8x16xf32>
    %189 = vector.extract_strided_slice %169 {offsets = [0, 16], sizes = [8, 16], strides = [1, 1]} : vector<8x64xf32> to vector<8x16xf32>
    %190 = vector.extract_strided_slice %173 {offsets = [0, 0], sizes = [8, 16], strides = [1, 1]} : vector<8x32xf32> to vector<8x16xf32>
    %191 = vector.extract_strided_slice %165 {offsets = [0, 0], sizes = [8, 16], strides = [1, 1]} : vector<8x32xf32> to vector<8x16xf32>
    %cst_84 = arith.constant dense<0.000000e+00> : vector<8x8xf32>
    %192 = tpu.matmul %189, %190, %cst_84 {dimension_numbers = #tpu.dot_dimension_numbers<[1], [1], [0], [0], [0, 0, 1, 0], [], []>} : vector<8x16xf32>, vector<8x16xf32>, vector<8x8xf32> -> vector<8x8xf32>
    %193 = arith.addf %192, %3 : vector<8x8xf32>
    %cst_85 = arith.constant dense<0xFF800000> : vector<8xf32>
    %194 = vector.multi_reduction <maximumf>, %193, %cst_85 [1] : vector<8x8xf32> to vector<8xf32>
    %195 = vector.shape_cast %194 : vector<8xf32> to vector<8x1xf32>
    %196 = vector.broadcast %195 : vector<8x1xf32> to vector<8x8xf32>
    %197 = arith.subf %193, %196 : vector<8x8xf32>
    %198 = math.exp %197 : vector<8x8xf32>
    %cst_86 = arith.constant dense<0.000000e+00> : vector<8xf32>
    %199 = vector.multi_reduction <add>, %198, %cst_86 [1] : vector<8x8xf32> to vector<8xf32>
    %200 = vector.shape_cast %199 : vector<8xf32> to vector<8x1xf32>
    %201 = vector.broadcast %200 : vector<8x1xf32> to vector<8x8xf32>
    %202 = arith.divf %198, %201 : vector<8x8xf32>
    %cst_87 = arith.constant dense<0.000000e+00> : vector<8x16xf32>
    %203 = tpu.matmul %202, %191, %cst_87 {dimension_numbers = #tpu.dot_dimension_numbers<[1], [0], [0], [1], [0, 0, 1, 1], [], []>} : vector<8x8xf32>, vector<8x16xf32>, vector<8x16xf32> -> vector<8x16xf32>
    %204 = vector.extract_strided_slice %169 {offsets = [0, 32], sizes = [8, 16], strides = [1, 1]} : vector<8x64xf32> to vector<8x16xf32>
    %205 = vector.extract_strided_slice %173 {offsets = [0, 16], sizes = [8, 16], strides = [1, 1]} : vector<8x32xf32> to vector<8x16xf32>
    %206 = vector.extract_strided_slice %165 {offsets = [0, 16], sizes = [8, 16], strides = [1, 1]} : vector<8x32xf32> to vector<8x16xf32>
    %cst_88 = arith.constant dense<0.000000e+00> : vector<8x8xf32>
    %207 = tpu.matmul %204, %205, %cst_88 {dimension_numbers = #tpu.dot_dimension_numbers<[1], [1], [0], [0], [0, 0, 1, 0], [], []>} : vector<8x16xf32>, vector<8x16xf32>, vector<8x8xf32> -> vector<8x8xf32>
    %208 = arith.addf %207, %3 : vector<8x8xf32>
    %cst_89 = arith.constant dense<0xFF800000> : vector<8xf32>
    %209 = vector.multi_reduction <maximumf>, %208, %cst_89 [1] : vector<8x8xf32> to vector<8xf32>
    %210 = vector.shape_cast %209 : vector<8xf32> to vector<8x1xf32>
    %211 = vector.broadcast %210 : vector<8x1xf32> to vector<8x8xf32>
    %212 = arith.subf %208, %211 : vector<8x8xf32>
    %213 = math.exp %212 : vector<8x8xf32>
    %cst_90 = arith.constant dense<0.000000e+00> : vector<8xf32>
    %214 = vector.multi_reduction <add>, %213, %cst_90 [1] : vector<8x8xf32> to vector<8xf32>
    %215 = vector.shape_cast %214 : vector<8xf32> to vector<8x1xf32>
    %216 = vector.broadcast %215 : vector<8x1xf32> to vector<8x8xf32>
    %217 = arith.divf %213, %216 : vector<8x8xf32>
    %cst_91 = arith.constant dense<0.000000e+00> : vector<8x16xf32>
    %218 = tpu.matmul %217, %206, %cst_91 {dimension_numbers = #tpu.dot_dimension_numbers<[1], [0], [0], [1], [0, 0, 1, 1], [], []>} : vector<8x8xf32>, vector<8x16xf32>, vector<8x16xf32> -> vector<8x16xf32>
    %219 = vector.extract_strided_slice %169 {offsets = [0, 48], sizes = [8, 16], strides = [1, 1]} : vector<8x64xf32> to vector<8x16xf32>
    %220 = vector.extract_strided_slice %173 {offsets = [0, 16], sizes = [8, 16], strides = [1, 1]} : vector<8x32xf32> to vector<8x16xf32>
    %221 = vector.extract_strided_slice %165 {offsets = [0, 16], sizes = [8, 16], strides = [1, 1]} : vector<8x32xf32> to vector<8x16xf32>
    %cst_92 = arith.constant dense<0.000000e+00> : vector<8x8xf32>
    %222 = tpu.matmul %219, %220, %cst_92 {dimension_numbers = #tpu.dot_dimension_numbers<[1], [1], [0], [0], [0, 0, 1, 0], [], []>} : vector<8x16xf32>, vector<8x16xf32>, vector<8x8xf32> -> vector<8x8xf32>
    %223 = arith.addf %222, %3 : vector<8x8xf32>
    %cst_93 = arith.constant dense<0xFF800000> : vector<8xf32>
    %224 = vector.multi_reduction <maximumf>, %223, %cst_93 [1] : vector<8x8xf32> to vector<8xf32>
    %225 = vector.shape_cast %224 : vector<8xf32> to vector<8x1xf32>
    %226 = vector.broadcast %225 : vector<8x1xf32> to vector<8x8xf32>
    %227 = arith.subf %223, %226 : vector<8x8xf32>
    %228 = math.exp %227 : vector<8x8xf32>
    %cst_94 = arith.constant dense<0.000000e+00> : vector<8xf32>
    %229 = vector.multi_reduction <add>, %228, %cst_94 [1] : vector<8x8xf32> to vector<8xf32>
    %230 = vector.shape_cast %229 : vector<8xf32> to vector<8x1xf32>
    %231 = vector.broadcast %230 : vector<8x1xf32> to vector<8x8xf32>
    %232 = arith.divf %228, %231 : vector<8x8xf32>
    %cst_95 = arith.constant dense<0.000000e+00> : vector<8x16xf32>
    %233 = tpu.matmul %232, %221, %cst_95 {dimension_numbers = #tpu.dot_dimension_numbers<[1], [0], [0], [1], [0, 0, 1, 1], [], []>} : vector<8x8xf32>, vector<8x16xf32>, vector<8x16xf32> -> vector<8x16xf32>
    %234 = tpu.concatenate %188, %203, %218, %233 in 1 : vector<8x16xf32>, vector<8x16xf32>, vector<8x16xf32>, vector<8x16xf32> -> vector<8x64xf32>
    %235 = arith.truncf %234 : vector<8x64xf32> to vector<8x64xbf16>
    %c1_96 = arith.constant 1 : index
    %c0_97 = arith.constant 0 : index
    %c0_98 = arith.constant 0 : index
    %236 = vector.load %arg12[%c1_96, %c0_97, %c0_98] : memref<2x64x64xbf16, #tpu.memory_space<vmem>>, vector<1x64x64xbf16>
    %237 = vector.shape_cast %236 : vector<1x64x64xbf16> to vector<64x64xbf16>
    %cst_99 = arith.constant dense<0.000000e+00> : vector<8x64xf32>
    %238 = tpu.matmul %235, %237, %cst_99 {dimension_numbers = #tpu.dot_dimension_numbers<[1], [0], [0], [1], [0, 0, 1, 1], [], []>} : vector<8x64xbf16>, vector<64x64xbf16>, vector<8x64xf32> -> vector<8x64xf32>
    %239 = arith.addf %140, %238 : vector<8x64xf32>
    %c1_100 = arith.constant 1 : index
    %c0_101 = arith.constant 0 : index
    %c0_102 = arith.constant 0 : index
    %240 = vector.load %arg13[%c1_100, %c0_101, %c0_102] : memref<2x1x64xf32, #tpu.memory_space<vmem>>, vector<1x1x64xf32>
    %241 = vector.shape_cast %240 : vector<1x1x64xf32> to vector<1x64xf32>
    %242 = arith.mulf %239, %239 : vector<8x64xf32>
    %cst_103 = arith.constant dense<0.000000e+00> : vector<8xf32>
    %243 = vector.multi_reduction <add>, %242, %cst_103 [1] : vector<8x64xf32> to vector<8xf32>
    %244 = vector.shape_cast %243 : vector<8xf32> to vector<8x1xf32>
    %cst_104 = arith.constant 6.400000e+01 : f32
    %245 = vector.broadcast %cst_104 : f32 to vector<8x1xf32>
    %246 = arith.divf %244, %245 : vector<8x1xf32>
    %cst_105 = arith.constant 9.99999997E-7 : f32
    %247 = vector.broadcast %cst_105 : f32 to vector<8x1xf32>
    %248 = arith.addf %246, %247 : vector<8x1xf32>
    %249 = math.rsqrt %248 : vector<8x1xf32>
    %250 = vector.broadcast %249 : vector<8x1xf32> to vector<8x64xf32>
    %251 = arith.mulf %239, %250 : vector<8x64xf32>
    %252 = vector.broadcast %241 : vector<1x64xf32> to vector<8x64xf32>
    %253 = arith.mulf %251, %252 : vector<8x64xf32>
    %254 = arith.truncf %253 : vector<8x64xf32> to vector<8x64xbf16>
    %c1_106 = arith.constant 1 : index
    %c0_107 = arith.constant 0 : index
    %c0_108 = arith.constant 0 : index
    %255 = vector.load %arg14[%c1_106, %c0_107, %c0_108] : memref<2x64x256xbf16, #tpu.memory_space<vmem>>, vector<1x64x256xbf16>
    %256 = vector.shape_cast %255 : vector<1x64x256xbf16> to vector<64x256xbf16>
    %cst_109 = arith.constant dense<0.000000e+00> : vector<8x256xf32>
    %257 = tpu.matmul %254, %256, %cst_109 {dimension_numbers = #tpu.dot_dimension_numbers<[1], [0], [0], [1], [0, 0, 1, 1], [], []>} : vector<8x64xbf16>, vector<64x256xbf16>, vector<8x256xf32> -> vector<8x256xf32>
    %258 = vector.extract_strided_slice %257 {offsets = [0, 0], sizes = [8, 128], strides = [1, 1]} : vector<8x256xf32> to vector<8x128xf32>
    %259 = vector.extract_strided_slice %257 {offsets = [0, 128], sizes = [8, 128], strides = [1, 1]} : vector<8x256xf32> to vector<8x128xf32>
    %260 = arith.negf %258 : vector<8x128xf32>
    %261 = math.exp %260 : vector<8x128xf32>
    %cst_110 = arith.constant 1.000000e+00 : f32
    %262 = vector.broadcast %cst_110 : f32 to vector<8x128xf32>
    %263 = arith.addf %262, %261 : vector<8x128xf32>
    %264 = arith.divf %262, %263 : vector<8x128xf32>
    %265 = arith.mulf %258, %264 : vector<8x128xf32>
    %266 = arith.mulf %265, %259 : vector<8x128xf32>
    %267 = arith.truncf %266 : vector<8x128xf32> to vector<8x128xbf16>
    %c1_111 = arith.constant 1 : index
    %c0_112 = arith.constant 0 : index
    %c0_113 = arith.constant 0 : index
    %268 = vector.load %arg15[%c1_111, %c0_112, %c0_113] : memref<2x128x64xbf16, #tpu.memory_space<vmem>>, vector<1x128x64xbf16>
    %269 = vector.shape_cast %268 : vector<1x128x64xbf16> to vector<128x64xbf16>
    %cst_114 = arith.constant dense<0.000000e+00> : vector<8x64xf32>
    %270 = tpu.matmul %267, %269, %cst_114 {dimension_numbers = #tpu.dot_dimension_numbers<[1], [0], [0], [1], [0, 0, 1, 1], [], []>} : vector<8x128xbf16>, vector<128x64xbf16>, vector<8x64xf32> -> vector<8x64xf32>
    %271 = arith.addf %239, %270 : vector<8x64xf32>
    %c0_115 = arith.constant 0 : index
    %c0_116 = arith.constant 0 : index
    %272 = vector.load %arg16[%c0_115, %c0_116] : memref<1x64xf32, #tpu.memory_space<vmem>>, vector<1x64xf32>
    %273 = arith.mulf %271, %271 : vector<8x64xf32>
    %cst_117 = arith.constant dense<0.000000e+00> : vector<8xf32>
    %274 = vector.multi_reduction <add>, %273, %cst_117 [1] : vector<8x64xf32> to vector<8xf32>
    %275 = vector.shape_cast %274 : vector<8xf32> to vector<8x1xf32>
    %cst_118 = arith.constant 6.400000e+01 : f32
    %276 = vector.broadcast %cst_118 : f32 to vector<8x1xf32>
    %277 = arith.divf %275, %276 : vector<8x1xf32>
    %cst_119 = arith.constant 9.99999997E-7 : f32
    %278 = vector.broadcast %cst_119 : f32 to vector<8x1xf32>
    %279 = arith.addf %277, %278 : vector<8x1xf32>
    %280 = math.rsqrt %279 : vector<8x1xf32>
    %281 = vector.broadcast %280 : vector<8x1xf32> to vector<8x64xf32>
    %282 = arith.mulf %271, %281 : vector<8x64xf32>
    %283 = vector.broadcast %272 : vector<1x64xf32> to vector<8x64xf32>
    %284 = arith.mulf %282, %283 : vector<8x64xf32>
    %285 = arith.truncf %284 : vector<8x64xf32> to vector<8x64xbf16>
    %c0_120 = arith.constant 0 : index
    %c0_121 = arith.constant 0 : index
    %286 = vector.load %arg17[%c0_120, %c0_121] : memref<64x128xbf16, #tpu.memory_space<vmem>>, vector<64x128xbf16>
    %cst_122 = arith.constant dense<0.000000e+00> : vector<8x128xf32>
    %287 = tpu.matmul %285, %286, %cst_122 {dimension_numbers = #tpu.dot_dimension_numbers<[1], [0], [0], [1], [0, 0, 1, 1], [], []>} : vector<8x64xbf16>, vector<64x128xbf16>, vector<8x128xf32> -> vector<8x128xf32>
    %c0_123 = arith.constant 0 : index
    %c0_124 = arith.constant 0 : index
    %c0_125 = arith.constant 0 : index
    %288 = vector.load %arg19[%c0_123, %c0_124, %c0_125] : memref<1x8x128xf32, #tpu.memory_space<vmem>>, vector<1x8x128xf32>
    %289 = vector.shape_cast %288 : vector<1x8x128xf32> to vector<8x128xf32>
    %290 = vector.shape_cast %287 : vector<8x128xf32> to vector<1x8x128xf32>
    tpu.vector_store %arg19[%c0_123, %c0_124, %c0_125], %290 {strides = array<i32>} : memref<1x8x128xf32, #tpu.memory_space<vmem>>, vector<1x8x128xf32>,
    %c0_126 = arith.constant 0 : index
    %c0_127 = arith.constant 0 : index
    %c0_128 = arith.constant 0 : index
    %291 = vector.load %arg18[%c0_126, %c0_127, %c0_128] : memref<1x8x1xi32, #tpu.memory_space<vmem>>, vector<1x8x1xi32>
    %292 = vector.shape_cast %291 : vector<1x8x1xi32> to vector<8x1xi32>
    %cst_129 = arith.constant dense<0xFF800000> : vector<8xf32>
    %293 = vector.multi_reduction <maximumf>, %287, %cst_129 [1] : vector<8x128xf32> to vector<8xf32>
    %294 = vector.shape_cast %293 : vector<8xf32> to vector<8x1xf32>
    %295 = vector.broadcast %294 : vector<8x1xf32> to vector<8x128xf32>
    %296 = arith.subf %287, %295 : vector<8x128xf32>
    %297 = math.exp %296 : vector<8x128xf32>
    %cst_130 = arith.constant dense<0.000000e+00> : vector<8xf32>
    %298 = vector.multi_reduction <add>, %297, %cst_130 [1] : vector<8x128xf32> to vector<8xf32>
    %299 = vector.shape_cast %298 : vector<8xf32> to vector<8x1xf32>
    %300 = math.log %299 : vector<8x1xf32>
    %301 = arith.addf %294, %300 : vector<8x1xf32>
    %302 = tpu.iota {dimensions = array<i32: 1>} : vector<8x128xi32>
    %303 = vector.broadcast %292 : vector<8x1xi32> to vector<8x128xi32>
    %304 = arith.cmpi eq, %302, %303 : vector<8x128xi32>
    %cst_131 = arith.constant 0.000000e+00 : f32
    %305 = vector.broadcast %cst_131 : f32 to vector<8x128xf32>
    %306 = arith.select %304, %287, %305 : vector<8x128xi1>, vector<8x128xf32>
    %cst_132 = arith.constant dense<0.000000e+00> : vector<8xf32>
    %307 = vector.multi_reduction <add>, %306, %cst_132 [1] : vector<8x128xf32> to vector<8xf32>
    %308 = vector.shape_cast %307 : vector<8xf32> to vector<8x1xf32>
    %309 = arith.subf %301, %308 : vector<8x1xf32>
    %c0_133 = arith.constant 0 : index
    %c0_134 = arith.constant 0 : index
    %c0_135 = arith.constant 0 : index
    %310 = vector.load %arg20[%c0_133, %c0_134, %c0_135] : memref<1x8x1xf32, #tpu.memory_space<vmem>>, vector<1x8x1xf32>
    %311 = vector.shape_cast %310 : vector<1x8x1xf32> to vector<8x1xf32>
    %312 = vector.shape_cast %309 : vector<8x1xf32> to vector<1x8x1xf32>
    tpu.vector_store %arg20[%c0_133, %c0_134, %c0_135], %312 {strides = array<i32>} : memref<1x8x1xf32, #tpu.memory_space<vmem>>, vector<1x8x1xf32>,
    return
  }
  func.func @transform_0(%arg0: i32) -> (i32, i32, i32) {
    %c0_i32 = arith.constant 0 : i32
    %c0_i32_0 = arith.constant 0 : i32
    %c0_i32_1 = arith.constant 0 : i32
    return %arg0, %c0_i32, %c0_i32_0 : i32, i32, i32
  }
  func.func @transform_1(%arg0: i32) -> (i32, i32, i32) {
    %c0_i32 = arith.constant 0 : i32
    %c0_i32_0 = arith.constant 0 : i32
    %c0_i32_1 = arith.constant 0 : i32
    return %arg0, %c0_i32, %c0_i32_0 : i32, i32, i32
  }
  func.func @transform_2(%arg0: i32) -> (i32, i32) {
    %c0_i32 = arith.constant 0 : i32
    %c0_i32_0 = arith.constant 0 : i32
    %c0_i32_1 = arith.constant 0 : i32
    return %c0_i32, %c0_i32_0 : i32, i32
  }
  func.func @transform_3(%arg0: i32) -> (i32, i32) {
    %c0_i32 = arith.constant 0 : i32
    %c0_i32_0 = arith.constant 0 : i32
    %c0_i32_1 = arith.constant 0 : i32
    return %c0_i32, %c0_i32_0 : i32, i32
  }
  func.func @transform_4(%arg0: i32) -> (i32, i32) {
    %c0_i32 = arith.constant 0 : i32
    %c0_i32_0 = arith.constant 0 : i32
    %c0_i32_1 = arith.constant 0 : i32
    return %c0_i32, %c0_i32_0 : i32, i32
  }
  func.func @transform_5(%arg0: i32) -> (i32, i32) {
    %c0_i32 = arith.constant 0 : i32
    %c0_i32_0 = arith.constant 0 : i32
    %c0_i32_1 = arith.constant 0 : i32
    return %c0_i32, %c0_i32_0 : i32, i32
  }
  func.func @transform_6(%arg0: i32) -> (i32, i32) {
    %c0_i32 = arith.constant 0 : i32
    %c0_i32_0 = arith.constant 0 : i32
    %c0_i32_1 = arith.constant 0 : i32
    return %c0_i32, %c0_i32_0 : i32, i32
  }
  func.func @transform_7(%arg0: i32) -> (i32, i32) {
    %c0_i32 = arith.constant 0 : i32
    %c0_i32_0 = arith.constant 0 : i32
    %c0_i32_1 = arith.constant 0 : i32
    return %c0_i32, %c0_i32_0 : i32, i32
  }
  func.func @transform_8(%arg0: i32) -> (i32, i32, i32) {
    %c0_i32 = arith.constant 0 : i32
    %c0_i32_0 = arith.constant 0 : i32
    %c0_i32_1 = arith.constant 0 : i32
    %c0_i32_2 = arith.constant 0 : i32
    return %c0_i32, %c0_i32_0, %c0_i32_1 : i32, i32, i32
  }
  func.func @transform_9(%arg0: i32) -> (i32, i32, i32) {
    %c0_i32 = arith.constant 0 : i32
    %c0_i32_0 = arith.constant 0 : i32
    %c0_i32_1 = arith.constant 0 : i32
    %c0_i32_2 = arith.constant 0 : i32
    return %c0_i32, %c0_i32_0, %c0_i32_1 : i32, i32, i32
  }
  func.func @transform_10(%arg0: i32) -> (i32, i32, i32) {
    %c0_i32 = arith.constant 0 : i32
    %c0_i32_0 = arith.constant 0 : i32
    %c0_i32_1 = arith.constant 0 : i32
    %c0_i32_2 = arith.constant 0 : i32
    return %c0_i32, %c0_i32_0, %c0_i32_1 : i32, i32, i32
  }
  func.func @transform_11(%arg0: i32) -> (i32, i32, i32) {
    %c0_i32 = arith.constant 0 : i32
    %c0_i32_0 = arith.constant 0 : i32
    %c0_i32_1 = arith.constant 0 : i32
    %c0_i32_2 = arith.constant 0 : i32
    return %c0_i32, %c0_i32_0, %c0_i32_1 : i32, i32, i32
  }
  func.func @transform_12(%arg0: i32) -> (i32, i32, i32) {
    %c0_i32 = arith.constant 0 : i32
    %c0_i32_0 = arith.constant 0 : i32
    %c0_i32_1 = arith.constant 0 : i32
    %c0_i32_2 = arith.constant 0 : i32
    return %c0_i32, %c0_i32_0, %c0_i32_1 : i32, i32, i32
  }
  func.func @transform_13(%arg0: i32) -> (i32, i32, i32) {
    %c0_i32 = arith.constant 0 : i32
    %c0_i32_0 = arith.constant 0 : i32
    %c0_i32_1 = arith.constant 0 : i32
    %c0_i32_2 = arith.constant 0 : i32
    return %c0_i32, %c0_i32_0, %c0_i32_1 : i32, i32, i32
  }
  func.func @transform_14(%arg0: i32) -> (i32, i32, i32) {
    %c0_i32 = arith.constant 0 : i32
    %c0_i32_0 = arith.constant 0 : i32
    %c0_i32_1 = arith.constant 0 : i32
    %c0_i32_2 = arith.constant 0 : i32
    return %c0_i32, %c0_i32_0, %c0_i32_1 : i32, i32, i32
  }
  func.func @transform_15(%arg0: i32) -> (i32, i32) {
    %c0_i32 = arith.constant 0 : i32
    %c0_i32_0 = arith.constant 0 : i32
    %c0_i32_1 = arith.constant 0 : i32
    return %c0_i32, %c0_i32_0 : i32, i32
  }
  func.func @transform_16(%arg0: i32) -> (i32, i32) {
    %c0_i32 = arith.constant 0 : i32
    %c0_i32_0 = arith.constant 0 : i32
    %c0_i32_1 = arith.constant 0 : i32
    return %c0_i32, %c0_i32_0 : i32, i32
  }
  func.func @transform_17(%arg0: i32) -> (i32, i32, i32) {
    %c0_i32 = arith.constant 0 : i32
    %c0_i32_0 = arith.constant 0 : i32
    %c0_i32_1 = arith.constant 0 : i32
    return %arg0, %c0_i32, %c0_i32_0 : i32, i32, i32
  }
  func.func @transform_18(%arg0: i32) -> (i32, i32, i32) {
    %c0_i32 = arith.constant 0 : i32
    %c0_i32_0 = arith.constant 0 : i32
    %c0_i32_1 = arith.constant 0 : i32
    return %arg0, %c0_i32, %c0_i32_0 : i32, i32, i32
  }
  func.func @transform_19(%arg0: i32) -> (i32, i32, i32) {
    %c0_i32 = arith.constant 0 : i32
    %c0_i32_0 = arith.constant 0 : i32
    %c0_i32_1 = arith.constant 0 : i32
    return %arg0, %c0_i32, %c0_i32_0 : i32, i32, i32
  }
}

</mosaic_0001>

<bundles_post_ra>
// kernel: tile.34
= control target key start
LH: loop header
LB: loop body
LE: loop exit
PB: predicated region body
PF: predicated region fallthrough
CT: control target
= control target key end

     0   :  { %vm42_vm0 = vcmask 1047556   ;;  %vm44_vm1 = vcmask 130048   ;;  %vm54_vm2 = vcmask 261248   ;;  %s111_s0 = inlined_call_operand.vmem [shape: f32[8,2,16], index: 0, kind: input, shape index: {}]   ;;  %s112_s1 = inlined_call_operand.vmem [shape: f32[8,32], index: 1, kind: output, shape index: {}]  }
   0x1   :  { %v62_v0 = vld [vmem:[%s111_s0 + $0xe] sm:$0x3]  ;;  %v63_v1 = vld [vmem:[%s111_s0 + $0xc] sm:$0x3]  ;;  %v64_v2 = vld [vmem:[%s111_s0 + $0xa] sm:$0x3] }
   0x2   :  { %8 = vst [vmem:[#allocation0 + $0x38] sm:$0x3] %v62_v0  ;;  %13 = vst [vmem:[#allocation0 + $0x30] sm:$0x3] %v63_v1  ;;  %v65_v3 = vld [vmem:[%s111_s0 + $0x8] sm:$0x3] }
   0x3   :  { %18 = vst [vmem:[#allocation0 + $0x28] sm:$0x3] %v64_v2  ;;  %v66_v4 = vld [vmem:[%s111_s0 + $0x6] sm:$0x3]  ;;  %v67_v5 = vld [vmem:[%s111_s0 + $0x4] sm:$0x3] }
   0x4   :  { %23 = vst [vmem:[#allocation0 + $0x20] sm:$0x3] %v65_v3  ;;  %28 = vst [vmem:[#allocation0 + $0x18] sm:$0x3] %v66_v4  ;;  %v68_v6 = vld [vmem:[%s111_s0 + $0x2] sm:$0x3] }
   0x5   :  { %33 = vst [vmem:[#allocation0 + $0x10] sm:$0x3] %v67_v5  ;;  %v38_v7 = vld [vmem:[%s111_s0] sm:$0x3]  ;;  %37 = vst [vmem:[#allocation0 + $0x8] sm:$0x3] %v68_v6 }
   0x6   :  { %39 = vst [vmem:[#allocation0] sm:$0x3] %v38_v7  ;;  %s70_s0 = smov 16  }
   0xb   :  { %v41_v8 = vld [vmem:[#allocation0] ss:$8 sm:$0xf0]   ;;  %v49_v9 = vld [vmem:[#allocation0 + $0x1] ss:$8 sm:$0xf0]  }
   0xd   :  { %v40_v10 = vld [vmem:[#allocation0] ss:$8 sm:$0xf]   ;;  %v47_v11 = vld [vmem:[#allocation0 + $0x1] ss:$8 sm:$0xf]  }
   0xe   :  { %v43_v12 = vsel %vm42_vm0, %v41_v8, %v40_v10  ;;  %v51_v13 = vsel %vm42_vm0, %v49_v9, %v47_v11 }
   0xf   :  { %52 = vrot.lane.b32.xlu0 %v51_v13, %s70_s0  ;;  %45 = vst.msk [vmem:[%s112_s1] sm:$0xff] %vm44_vm1, %v43_v12  }
  0x81   :  { %v53_v14 = vpop.permute.xlu0 %52  }
  0x82   :  { %55 = vst.msk [vmem:[%s112_s1] sm:$0xff] %vm54_vm2, %v53_v14  }

// kernel: qwen_forward.1
= control target key start
LH: loop header
LB: loop body
LE: loop exit
PB: predicated region body
PF: predicated region fallthrough
CT: control target
= control target key end

     0   :  { %s4861_s0 = inlined_call_operand.vmem [shape: f32[2,8,64], index: 0, kind: input, shape index: {}]   ;;  %s4862_s1 = inlined_call_operand.vmem [shape: f32[2,8,8], index: 1, kind: input, shape index: {}]   ;;  %s4863_s2 = inlined_call_operand.vmem [shape: f32[8,64], index: 2, kind: input, shape index: {}]   ;;  %s4864_s3 = inlined_call_operand.vmem [shape: f32[8,64], index: 3, kind: input, shape index: {}]   ;;  %s4865_s4 = inlined_call_operand.vmem [shape: f32[8,32], index: 4, kind: input, shape index: {}]   ;;  %s4866_s5 = inlined_call_operand.vmem [shape: f32[8,32], index: 5, kind: input, shape index: {}]   ;;  %s4867_s6 = inlined_call_operand.vmem [shape: f32[64,64], index: 6, kind: input, shape index: {}]   ;;  %s4868_s7 = inlined_call_operand.vmem [shape: f32[32,32], index: 7, kind: input, shape index: {}]   ;;  %s4869_s8 = inlined_call_operand.vmem [shape: f32[2,1,64], index: 8, kind: input, shape index: {}]   ;;  %s4870_s9 = inlined_call_operand.vmem [shape: bf16[2,64,128], index: 9, kind: input, shape index: {}]   ;;  %s4871_s10 = inlined_call_operand.vmem [shape: f32[2,1,128], index: 10, kind: input, shape index: {}]   ;;  %s4872_s11 = inlined_call_operand.vmem [shape: bf16[2,64,64], index: 11, kind: input, shape index: {}]   ;;  %s4873_s12 = inlined_call_operand.vmem [shape: f32[2,1,64], index: 12, kind: input, shape index: {}]   ;;  %s4874_s13 = inlined_call_operand.vmem [shape: bf16[2,64,256], index: 13, kind: input, shape index: {}]   ;;  %s4875_s14 = inlined_call_operand.vmem [shape: bf16[2,128,64], index: 14, kind: input, shape index: {}]   ;;  %s4876_s15 = inlined_call_operand.vmem [shape: f32[1,64], index: 15, kind: input, shape index: {}]   ;;  %s4877_s16 = inlined_call_operand.vmem [shape: bf16[64,128], index: 16, kind: input, shape index: {}]   ;;  %s4878_s17 = inlined_call_operand.vmem [shape: s32[2,8,1], index: 17, kind: input, shape index: {}]   ;;  %s4879_s18 = inlined_call_operand.hbm [shape: f32[2,8,128], index: 18, kind: output, shape index: {0}]   ;;  %s4880_s19 = inlined_call_operand.vmem [shape: f32[2,8,1], index: 19, kind: output, shape index: {1}]  }
   0x1   :  { %4896 = sst [smem:[#allocation9_spill]] %s4861_s0 }
   0x2   :  { %4897 = sst [smem:[#allocation10_spill]] %s4862_s1 }
   0x3   :  { %4898 = sst [smem:[#allocation11_spill]] %s4863_s2 }
   0x4   :  { %4899 = sst [smem:[#allocation12_spill]] %s4864_s3 }
   0x5   :  { %4900 = sst [smem:[#allocation13_spill]] %s4865_s4 }
   0x6   :  { %4901 = sst [smem:[#allocation14_spill]] %s4866_s5 }
   0x7   :  { %4902 = sst [smem:[#allocation15_spill]] %s4867_s6 }
   0x8   :  { %25 = vsyncpa [#allocation3], 0 }
   0x9   :  { %27 = vsyncpa [#allocation3 + $0x1], 0  ;;  %s4229_s0 = smov 0   ;;  %s4231_s30 = smov 0  }
   0xa   :  { %s4233_s20 = smov 0   ;;  %s4235_s21 = smov 0  }
   0xb LB: > { %4903 = sst [smem:[#allocation5_spill]] %s4111_s20  ;;  %s4250_s1 = sadd.s32 4294967295, %s4115_s21   ;;  %s4115_s21 = sphi %s4235_s21, %s4924_s21   ;;  %s4111_s20 = sphi %s4233_s20, %s4926_s20   ;;  %s4107_s30 = sphi %s4231_s30, %s4928_s30   ;;  %s4103_s0 = sphi %s4229_s0, %s4927_s0  }
   0xc   : > { %s3357_s22 = sadd.s32 4294967294, %s4115_s21   ;;  %s4254_s2 = sadd.s32 1, %s4115_s21  }
   0xd   : > { %4904 = sst [smem:[#allocation6_spill]] %s4254_s2  ;;  %s433_s23 = sadd.s32 1, %s4111_s20 }
   0xe   : > { %s430_s24 = ssub.s32 %s4115_s21, %s4254_s2  ;;  %p443_p0 = scmp.ne.s32.totalorder %s4111_s20, %s4107_s30 }
   0xf   : > { %p431_p1 = scmp.eq.s32.totalorder %s430_s24, 0  ;;  %p444_p2 = scmp.eq.s32.totalorder %s4250_s1, 1 }
  0x10   : > { %p449_p3 = scmp.ne.s32.totalorder %s4107_s30, %s4103_s0  ;;  %p450_p4 = scmp.eq.s32.totalorder %s3357_s22, 1 }
  0x11   : > { %s4265_s25 = scalar_select %p431_p1, %s4111_s20, %s433_s23  }
  0x12   : > { %p4267_p5 = por %p444_p2, %p443_p0  ;;  %p4271_p6 = por %p450_p4, %p449_p3 }
  0x13   : > { %4905 = sst [smem:[#allocation7_spill]] %s4265_s25  ;;  %p3360_p7 = scmp.ge.s32.totalorder %s4115_s21, 1 }
  0x14   : > { %s4907_s26 = scalar_select %p4271_p6, 1, 0 }
  0x15   : > { %p560_p8 = scmp.lt.s32.totalorder %s4115_s21, 3 }
  0x16   : > { %4908 = sst [smem:[#allocation8_spill]] %s4907_s26 }
  0x17   : > { %p561_p9 = pnand %p3360_p7, %p560_p8 }
  0x18   : > { %p627_p10 = scmp.lt.s32.totalorder (!%p561_p9), %s4250_s1, 1  ;;  %s4909_s23 = sld [smem:[#allocation9_spill]] (!%p561_p9)  ;;  %vm664_vm0 = vcmask (!%p561_p9), 523264   ;;  %v3939_v3 = vld [vmem:[%s4870_s9] sm:$0xff] (!%p561_p9)   ;;  %v4117_v4 = vmov (!%p561_p9), 0.0   ;;  %v3940_v5 = vld [vmem:[%s4870_s9 + $0x8] sm:$0xff] (!%p561_p9)  }
  0x19   : > { %564 = sbr.rel (%p561_p9) target bundleno = 6037 (0x1795), region = 92  ;;  %3612 = vmatprep.subr.bf16.mxu0 (!%p561_p9), %v4117_v4  ;;  %vm4118_vm1 = vmmov (!%p561_p9), 0   ;;  %v3941_v6 = vld [vmem:[%s4870_s9 + $0x10] sm:$0xff] (!%p561_p9)   ;;  %v3942_v7 = vld [vmem:[%s4870_s9 + $0x18] sm:$0xff] (!%p561_p9)   ;;  %s4910_s4 = sld [smem:[#allocation13_spill]] (!%p561_p9)  ;;  %v4120_v11 = vmov (!%p561_p9), 0.0|0.0  }
  0x1a   : > { %3620 = vmatprep.mubr.msk.bf16.mxu0 (!%p561_p9), %vm4118_vm1, %v4117_v4  ;;  %3613 = vmatpush3.bf16.msra.mxu0 (!%p561_p9), %v3939_v3  ;;  %s4911_s6 = sld [smem:[#allocation15_spill]] (!%p561_p9)  ;;  %s4888_s26 = smov (!%p561_p9), 64   ;;  %v3366_v23 = vld [vmem:[%s4869_s8] ss:$0 sm:$0xff] (!%p561_p9)  ;;  %v659_v31 = vld [vmem:[%s4868_s7 + $0x8] sm:$0xff] (!%p561_p9)  ;;  %v660_v37 = vld [vmem:[%s4868_s7 + $0x10] sm:$0xff] (!%p561_p9) }
  0x1b   : > { %3640 = vmatprep.mubr.msk.f32.mxu1 (!%p561_p9), %vm4118_vm1, %v4117_v4  ;;  %3614 = vmatprep.subr.bf16.mxu0 (!%p561_p9), %v4117_v4  ;;  %v658_v30 = vld [vmem:[%s4868_s7] sm:$0xff] (!%p561_p9)  ;;  %v661_v38 = vld [vmem:[%s4868_s7 + $0x18] sm:$0xff] (!%p561_p9)  ;;  %vm846_vm2 = vcmask (!%p561_p9), 261120   ;;  %s4912_s5 = sld [smem:[#allocation14_spill]] (!%p561_p9)  ;;  %s4914_s25 = sld [smem:[#allocation11_spill]] (!%p561_p9)  ;;  %vm928_vm3 = vcmask (!%p561_p9), 130048  }
  0x1c   : > { %3852 = vmatprep.subr.bf16.mxu1 (!%p561_p9), %v4120_v11  ;;  %v3367_v32 = vld [vmem:[%s4871_s10] ss:$0 sm:$0xff] (!%p561_p9)  ;;  %v4372_v34 = vpack.c.bf16 (!%p561_p9), %v659_v31, %v658_v30  ;;  %v4387_v41 = vpack.c.bf16 (!%p561_p9), %v661_v38, %v660_v37  ;;  %s4887_s2 = smov (!%p561_p9), 112   ;;  %s4890_s29 = smov (!%p561_p9), 48   ;;  %vm1004_vm4 = vcmask (!%p561_p9), 64512   ;;  %vm1587_vm5 = vcmask (!%p561_p9), 392192  }
  0x1d   : > { %s4886_s22 = smov (!%p561_p9), 96   ;;  %s4915_s20 = sld [smem:[#allocation10_spill]] (!%p561_p9) }
  0x1e   : > { %3615 = vmatpush3.bf16.msra.mxu0 (!%p561_p9), %v3940_v5 }
  0x1f   : > { %3616 = vmatprep.subr.bf16.mxu0 (!%p561_p9), %v4117_v4  ;;  %v648_v8 = vld [vmem:[%s4910_s4] sm:$0xff] (!%p561_p9)  ;;  %s4917_s4 = smov (!%p561_p9), 64  }
  0x20   : > { %s628_s27 = scalar_select %p627_p10, %s4250_s1, 1  ;;  %v650_v9 = vld [vmem:[%s4911_s6] sm:$0xff]  ;;  %v651_v10 = vld [vmem:[%s4911_s6 + $0x8] sm:$0xff]  ;;  %840 = vrot.lane.b32.xlu1 %v648_v8, %s4888_s26  ;;  %v652_v13 = vld [vmem:[%s4911_s6 + $0x10] sm:$0xff] }
  0x21   : > { %v4322_v12 = vpack.c.bf16 %v651_v10, %v650_v9  ;;  %v653_v14 = vld [vmem:[%s4911_s6 + $0x18] sm:$0xff]  ;;  %v654_v16 = vld [vmem:[%s4911_s6 + $0x20] sm:$0xff]  ;;  %v655_v17 = vld [vmem:[%s4911_s6 + $0x28] sm:$0xff] }
  0x22   : > { %s4279_s28 = sshll.u32 %s628_s27, 3  ;;  %3617 = vmatpush3.bf16.msra.mxu0 %v3941_v6  ;;  %v4331_v15 = vpack.c.bf16 %v653_v14, %v652_v13  ;;  %v4341_v18 = vpack.c.bf16 %v655_v17, %v654_v16  ;;  %v656_v27 = vld [vmem:[%s4911_s6 + $0x30] sm:$0xff]  ;;  %v657_v28 = vld [vmem:[%s4911_s6 + $0x38] sm:$0xff]  ;;  %v4400_v45 = vld [vmem:[%s4912_s5] sm:$0xff]  ;;  %s4892_s27 = smov 16  }
  0x23   : > { %s630_s24 = scalar_lea.vmem %s4909_s23, %s4279_s28  ;;  %3618 = vmatprep.subr.bf16.mxu0 %v4117_v4  ;;  %3854 = vmatpush3.bf16.msra.mxu1 %v4322_v12  ;;  %v4359_v29 = vpack.c.bf16 %v657_v28, %v656_v27  ;;  %v4416_v52 = vld [vmem:[%s4914_s25] sm:$0xff]  ;;  %s4885_s23 = smov 80  }
  0x24   : > { %v4285_v0 = vld [vmem:[%s630_s24] sm:$0xff]  ;;  %3855 = vmatprep.subr.bf16.mxu1 %v4120_v11  ;;  %s4913_s24 = sld [smem:[#allocation12_spill]]  ;;  %s634_s25 = scalar_lea.vmem %s4915_s20, %s4279_s28 }
  0x25   : > { %v663_v1 = vmul.f32 %v4285_v0, %v4285_v0  ;;  %v4450_v63 = vld [vmem:[%s634_s25] sm:$0xff]  ;;  %s4918_s5 = smov 112   ;;  %s638_s25 = scalar_lea.vmem %s4878_s17, %s4279_s28 }
  0x26   : > { %3619 = vmatpush3.bf16.msra.mxu0 %v3942_v7  ;;  %s3506_s20 = sshll.u32 %s4250_s1, 7 }
  0x27   : > { %v665_v2 = vsel %vm664_vm0, %v663_v1, 0.0  ;;  %3664 = vmatprep.subr.mxu0 %v4117_v4  ;;  %3857 = vmatpush3.bf16.msra.mxu1 %v4331_v15 }
  0x28   : > { %666 = vadd.xlane.f32.xlu0 %v665_v2  ;;  %3858 = vmatprep.subr.bf16.mxu1 %v4120_v11 }
  0x2a   : > { %v4409_v50 = vld [vmem:[%s4913_s24] sm:$0xff]  ;;  %s4894_s24 = smov 32  }
  0x2b   : > { %3860 = vmatpush3.bf16.msra.mxu1 %v4341_v18 }
  0x2c   : > { %3861 = vmatprep.subr.bf16.mxu1 %v4120_v11 }
  0x2f   : > { %3863 = vmatpush3.bf16.msra.mxu1 %v4359_v29 }
  0x30   : > { %3864 = vmatprep.subr.bf16.mxu1 %v4120_v11 }
  0x92   : > { %v4404_v49 = vpop.permute.xlu1 %840 }
  0xb5   : > { %v667_v19 = vpop.xlane.xlu0 %666 }
  0xb6   : > { %v669_v20 = vmul.f32 0.015625, %v667_v19 }
  0xb8   : > { %v670_v21 = vadd.f32 1e-06, %v669_v20 }
  0xba   : > { %3999 = vrsqrt.f32 %v670_v21 }
  0xc4   : > { %v4000_v22 = vpop.eup %3999 }
  0xc5   : > { %v672_v24 = vmul.f32 %v4000_v22, %v4285_v0 }
  0xc7   : > { %v679_v25 = vmul.f32 %v3366_v23, %v672_v24 }
  0xc9   : > { %v680_v26 = vpack.c.bf16 %v679_v25, %v679_v25 }
  0xcb   : > { %3621 = vmatmul.mubr.msk.bf16.vlgmr.msra.gmra.mrb[0].mxu0 %vm664_vm0, %v680_v26 }
  0xcc   : > { %3666 = vmatprep.mubr.msk.f32.mxu0 %vm4118_vm1, %v4117_v4 }
 0x19e   : > { %v757_v33 = vpop.f32.mrb[0].mxu0 }
 0x19f   : > { %v4374_v35 = vadd.f32 %v3367_v32, %v757_v33  ;;  %v3622_v36 = vpop.f32.mrb[1].mxu0 }
 0x1a0   : > { %v760_v39 = vpop.f32.mrb[2].mxu0 }
 0x1a1   : > { %844 = vrot.lane.b32.xlu0 %v4374_v35, %s4888_s26  ;;  %v3623_v40 = vpop.f32.mrb[3].mxu0  ;;  %3641 = vmatmul.mubr.msk.f32.vlgmr.msra.gmra.mrb[0].mxu1 %vm664_vm0, %v4374_v35  ;;  %v843_v51 = vmul.f32 %v4404_v49, %v4374_v35  ;;  %v763_v56 = vmul.f32 %v4374_v35, %v4416_v52 }
 0x1a2   : > { %3866 = vmatpush3.bf16.msra.mxu1 %v4372_v34  ;;  %3651 = vmatprep.mubr.msk.f32.mxu1 %vm4118_vm1, %v4117_v4 }
 0x1a3   : > { %3867 = vmatprep.subr.bf16.mxu1 %v4120_v11 }
 0x1a6   : > { %3869 = vmatpush3.bf16.msra.mxu1 %v4387_v41 }
 0x1a7   : > { %3654 = vmatprep.subr.mxu1 %v4117_v4 }
 0x213   : > { %v845_v42 = vpop.permute.xlu0 %844 }
 0x214   : > { %3652 = vmatmul.mubr.msk.f32.vlgmr.msra.gmra.mrb[2].mxu1 %vm846_vm2, %v845_v42 }
 0x215   : > { %3656 = vmatprep.mubr.msk.f32.mxu1 %vm4118_vm1, %v4117_v4 }
 0x274   : > { %v833_v43 = vpop.f32.mrb[0].mxu1 }
 0x275   : > { %v3642_v44 = vpop.f32.mrb[1].mxu1  ;;  %v837_v54 = vmul.f32 %v833_v43, %v4409_v50 }
 0x277   : > { %v838_v57 = vadd.f32 %v837_v54, %v763_v56 }
 0x2e7   : > { %v915_v46 = vpop.f32.mrb[2].mxu1 }
 0x2e8   : > { %v919_v47 = vmul.f32 %v915_v46, %v4400_v45  ;;  %v3653_v48 = vpop.f32.mrb[3].mxu1 }
 0x2ea   : > { %921 = vrot.lane.b32.xlu1 %v919_v47, %s4888_s26 }
 0x35c   : > { %v922_v53 = vpop.permute.xlu1 %921 }
 0x35d   : > { %v924_v55 = vadd.f32 %v922_v53, %v843_v51 }
 0x35f   : > { %926 = vrot.lane.b32.xlu1 %v924_v55, %s4888_s26  ;;  %s4916_s26 = smov 48  }
 0x363   : > { %1092 = vrot.lane.b32.xlu1 %v838_v57, %s4887_s2  ;;  %s4921_s2 = smov 32  }
 0x367   : > { %1252 = vrot.lane.b32.xlu1 %v924_v55, %s4890_s29  ;;  %s4922_s29 = smov 16  }
 0x36b   : > { %1250 = vrot.lane.b32.xlu1 %v838_v57, %s4886_s22 }
 0x36f   : > { %1415 = vrot.lane.b32.xlu1 %v838_v57, %s4885_s23  ;;  %s4128_s23 = smov [#allocation2]  }
 0x3d1   : > { %v927_v58 = vpop.permute.xlu1 %926 }
 0x3d2   : > { %3655 = vmatpush3.xpose.msk.msra.mxu1 %vm928_vm3, %v927_v58  ;;  %3665 = vmatpush3.xpose.msk.msra.mxu0 %vm928_vm3, %v927_v58 }
 0x3d3   : > { %3674 = vmatprep.subr.mxu0 %v4117_v4  ;;  %3659 = vmatprep.subr.mxu1 %v4117_v4 }
 0x3d5   : > { %v1093_v59 = vpop.permute.xlu1 %1092  ;;  %3657 = vmatmul.mubr.msk.f32.vlgmr.msra.gmra.mrb[4].mxu1 %vm928_vm3, %v838_v57 }
 0x3d6   : > { %3667 = vmatmul.mubr.msk.f32.vlgmr.msra.gmra.mrb[4].mxu0 %vm928_vm3, %v1093_v59  ;;  %3661 = vmatprep.mubr.msk.f32.mxu1 %vm4118_vm1, %v4117_v4 }
 0x3d7   : > { %3676 = vmatprep.mubr.msk.f32.mxu0 %vm4118_vm1, %v4117_v4 }
 0x3d9   : > { %v1253_v60 = vpop.permute.xlu1 %1252 }
 0x3da   : > { %3675 = vmatpush3.xpose.msk.msra.mxu0 %vm928_vm3, %v1253_v60 }
 0x3db   : > { %3684 = vmatprep.subr.mxu0 %v4117_v4 }
 0x3dd   : > { %v1251_v61 = vpop.permute.xlu1 %1250 }
 0x3de   : > { %3677 = vmatmul.mubr.msk.f32.vlgmr.msra.gmra.mrb[6].mxu0 %vm928_vm3, %v1251_v61 }
 0x3df   : > { %3685 = vmatpush3.xpose.msk.msra.mxu0 %vm928_vm3, %v1253_v60  ;;  %3686 = vmatprep.mubr.msk.f32.mxu0 %vm4118_vm1, %v4117_v4 }
 0x3e0   : > { %3694 = vmatprep.subr.bf16.mxu0 %v4117_v4 }
 0x3e1   : > { %v1416_v62 = vpop.permute.xlu1 %1415 }
 0x3e2   : > { %3687 = vmatmul.mubr.msk.f32.vlgmr.msra.gmra.mrb[8].mxu0 %vm928_vm3, %v1416_v62 }
 0x3e3   : > { %3702 = vmatprep.mubr.msk.bf16.mxu0 %vm4118_vm1, %v4117_v4 }
 0x4a8   : > { %v1000_v1 = vpop.f32.mrb[4].mxu1 }
 0x4a9   : > { %v1001_v2 = vadd.f32 %v1000_v1, %v4450_v63  ;;  %v3658_v3 = vpop.f32.mrb[5].mxu1  ;;  %v1162_v5 = vpop.f32.mrb[4].mxu0  ;;  %v3943_v1 = vld [vmem:[%s4872_s11] sm:$0xff]  }
 0x4aa   : > { %v1163_v6 = vadd.f32 %v1162_v5, %v4450_v63  ;;  %v3668_v7 = vpop.f32.mrb[5].mxu0  ;;  %3695 = vmatpush3.bf16.msra.mxu0 %v3943_v1  ;;  %v3945_v3 = vld [vmem:[%s4872_s11 + $0x10] sm:$0xff]   ;;  %v3946_v5 = vld [vmem:[%s4872_s11 + $0x18] sm:$0xff]  }
 0x4ab   : > { %v1005_v8 = vsel %vm1004_vm4, %v1001_v2, -inf  ;;  %3696 = vmatprep.subr.bf16.mxu0 %v4117_v4 }
 0x4ac   : > { %1006 = vmax.xlane.f32.xlu0 %v1005_v8  ;;  %v1166_v9 = vsel %vm1004_vm4, %v1163_v6, -inf }
 0x4ad   : > { %1167 = vmax.xlane.f32.xlu1 %v1166_v9 }
 0x4b1   : > { %v1324_v10 = vpop.f32.mrb[6].mxu0 }
 0x4b2   : > { %v1325_v13 = vadd.f32 %v1324_v10, %v4450_v63  ;;  %v3678_v14 = vpop.f32.mrb[7].mxu0 }
 0x4b4   : > { %v1328_v16 = vsel %vm1004_vm4, %v1325_v13, -inf }
 0x4b5   : > { %1329 = vmax.xlane.f32.xlu0 %v1328_v16  ;;  %v1485_v17 = vpop.f32.mrb[8].mxu0 }
 0x4b6   : > { %v1486_v19 = vadd.f32 %v1485_v17, %v4450_v63  ;;  %v3688_v20 = vpop.f32.mrb[9].mxu0 }
 0x4b8   : > { %v1489_v21 = vsel %vm1004_vm4, %v1486_v19, -inf }
 0x4b9   : > { %1490 = vmax.xlane.f32.xlu0 %v1489_v21 }
 0x539   : > { %v1007_v22 = vpop.xlane.xlu0 %1006 }
 0x53a   : > { %v1008_v23 = vsub.f32 %v1001_v2, %v1007_v22  ;;  %v1168_v24 = vpop.xlane.xlu1 %1167  ;;  %v3944_v2 = vld [vmem:[%s4872_s11 + $0x8] sm:$0xff]  }
 0x53b   : > { %v1169_v25 = vsub.f32 %v1163_v6, %v1168_v24  ;;  %3697 = vmatpush3.bf16.msra.mxu0 %v3944_v2 }
 0x53c   : > { %v1009_v26 = vmul.f32 1.442695, %v1008_v23  ;;  %3698 = vmatprep.subr.bf16.mxu0 %v4117_v4 }
 0x53d   : > { %v1170_v27 = vmul.f32 1.442695, %v1169_v25 }
 0x53e   : > { %4001 = vpow2.f32 %v1009_v26 }
 0x53f   : > { %4003 = vpow2.f32 %v1170_v27  ;;  %3699 = vmatpush3.bf16.msra.mxu0 %v3945_v3 }
 0x540   : > { %3700 = vmatprep.subr.bf16.mxu0 %v4117_v4 }
 0x542   : > { %v1330_v28 = vpop.xlane.xlu0 %1329 }
 0x543   : > { %v1331_v30 = vsub.f32 %v1325_v13, %v1330_v28  ;;  %3701 = vmatpush3.bf16.msra.mxu0 %v3946_v5 }
 0x544   : > { %3706 = vmatprep.subr.bf16.mxu0 %v4117_v4 }
 0x545   : > { %v1332_v31 = vmul.f32 1.442695, %v1331_v30 }
 0x546   : > { %v1491_v32 = vpop.xlane.xlu0 %1490 }
 0x547   : > { %4005 = vpow2.f32 %v1332_v31  ;;  %v1492_v33 = vsub.f32 %v1486_v19, %v1491_v32 }
 0x548   : > { %v4002_v36 = vpop.eup %4001 }
 0x549   : > { %v4004_v37 = vpop.eup %4003  ;;  %v1493_v38 = vmul.f32 1.442695, %v1492_v33  ;;  %v1011_v39 = vsel %vm1004_vm4, %v4002_v36, 0.0  ;;  %v3949_v33 = vld [vmem:[%s4874_s13 + $0x4] ss:$8 sps:$4 sm:$0xff]  }
 0x54a   : > { %1012 = vadd.xlane.f32.xlu1 %v1011_v39  ;;  %v1172_v40 = vsel %vm1004_vm4, %v4004_v37, 0.0  ;;  %v3953_v39 = vld [vmem:[%s4874_s13 + $0x20] ss:$8 sps:$4 sm:$0xff]  }
 0x54b   : > { %4007 = vpow2.f32 %v1493_v38  ;;  %1173 = vadd.xlane.f32.xlu0 %v1172_v40  ;;  %v3955_v38 = vld [vmem:[%s4874_s13 + $0x24] ss:$8 sps:$4 sm:$0xff]   ;;  %v3956_v40 = vld [vmem:[%s4874_s13 + $0x30] ss:$8 sps:$4 sm:$0xff]  }
 0x551   : > { %v4006_v42 = vpop.eup %4005 }
 0x552   : > { %v1334_v43 = vsel %vm1004_vm4, %v4006_v42, 0.0 }
 0x553   : > { %1335 = vadd.xlane.f32.xlu1 %v1334_v43  ;;  %v4127_v43 = vmov 0  }
 0x554   : > { %3938 = vset.pattern.permute.xlu0 %v4127_v43 }
 0x555   : > { %v4008_v44 = vpop.eup %4007 }
 0x556   : > { %v1495_v46 = vsel %vm1004_vm4, %v4008_v44, 0.0 }
 0x557   : > { %1496 = vadd.xlane.f32.xlu0 %v1495_v46 }
 0x564   : > { %1016 = vrot.lane.b32.xlu1 %v4374_v35, %s4894_s24 }
 0x56d   : > { %1339 = vrot.lane.b32.xlu0 %v4374_v35, %s4892_s27 }
 0x5d7   : > { %v1013_v47 = vpop.xlane.xlu1 %1012 }
 0x5d8   : > { %4009 = vrcp.f32 %v1013_v47  ;;  %v1174_v48 = vpop.xlane.xlu0 %1173 }
 0x5d9   : > { %4011 = vrcp.f32 %v1174_v48 }
 0x5e0   : > { %v1336_v51 = vpop.xlane.xlu1 %1335 }
 0x5e1   : > { %4013 = vrcp.f32 %v1336_v51  ;;  %v3392_v51 = vld [vmem:[%s4873_s12] ss:$0 sm:$0xff] }
 0x5e2   : > { %v4010_v53 = vpop.eup %4009 }
 0x5e3   : > { %v1015_v54 = vmul.f32 %v4010_v53, %v4002_v36  ;;  %v4012_v57 = vpop.eup %4011  ;;  %v3947_v36 = vld [vmem:[%s4874_s13] ss:$8 sps:$4 sm:$0xff]  }
 0x5e4   : > { %v1017_v55 = vpop.permute.xlu1 %1016  ;;  %v1497_v56 = vpop.xlane.xlu0 %1496  ;;  %v1176_v35 = vmul.f32 %v4012_v57, %v4004_v37  ;;  %v3950_v37 = vld [vmem:[%s4874_s13 + $0x10] ss:$8 sps:$4 sm:$0xff]   ;;  %v3960_v57 = vld [vmem:[%s4875_s14 + $0x8] sm:$0xff]  }
 0x5e5   : > { %4015 = vrcp.f32 %v1497_v56  ;;  %3660 = vmatpush3.msra.mxu1 %v1017_v55  ;;  %v3959_v56 = vld [vmem:[%s4875_s14] sm:$0xff]  }
 0x5e6   : > { %3662 = vmatmul.mubr.msk.f32.vlgmr.msra.gmra.mrb[6].mxu1 %vm1004_vm4, %v1015_v54  ;;  %3669 = vmatprep.subr.mxu1 %v4117_v4 }
 0x5e7   : > { %3670 = vmatpush3.msra.mxu1 %v1017_v55  ;;  %3671 = vmatprep.mubr.msk.f32.mxu1 %vm4118_vm1, %v4117_v4 }
 0x5e8   : > { %v1340_v58 = vpop.permute.xlu0 %1339  ;;  %3679 = vmatprep.subr.mxu1 %v4117_v4 }
 0x5ea   : > { %3672 = vmatmul.mubr.msk.f32.vlgmr.msra.gmra.mrb[8].mxu1 %vm1004_vm4, %v1176_v35  ;;  %v3961_v35 = vld [vmem:[%s4875_s14 + $0x10] sm:$0xff]  }
 0x5eb   : > { %v4014_v59 = vpop.eup %4013  ;;  %3680 = vmatpush3.msra.mxu1 %v1340_v58  ;;  %3681 = vmatprep.mubr.msk.f32.mxu1 %vm4118_vm1, %v4117_v4 }
 0x5ec   : > { %v1338_v60 = vmul.f32 %v4014_v59, %v4006_v42  ;;  %3689 = vmatprep.subr.mxu1 %v4117_v4  ;;  %v3958_v42 = vld [vmem:[%s4874_s13 + $0x34] ss:$8 sps:$4 sm:$0xff]   ;;  %v3963_v59 = vld [vmem:[%s4875_s14 + $0x20] sm:$0xff]  }
 0x5ee   : > { %3682 = vmatmul.mubr.msk.f32.vlgmr.msra.gmra.mrb[10].mxu1 %vm1004_vm4, %v1338_v60  ;;  %v3964_v60 = vld [vmem:[%s4875_s14 + $0x28] sm:$0xff]  }
 0x5ef   : > { %v4016_v61 = vpop.eup %4015  ;;  %3690 = vmatpush3.msra.mxu1 %v1340_v58  ;;  %3691 = vmatprep.mubr.msk.f32.mxu1 %vm4118_vm1, %v4117_v4  ;;  %v3962_v58 = vld [vmem:[%s4875_s14 + $0x18] sm:$0xff]  }
 0x5f0   : > { %v1499_v62 = vmul.f32 %v4016_v61, %v4008_v44  ;;  %1734 = vmatprep.subr.bf16.mxu1 %v3949_v33  ;;  %v3965_v61 = vld [vmem:[%s4875_s14 + $0x30] sm:$0xff]  }
 0x5f2   : > { %3692 = vmatmul.mubr.msk.f32.vlgmr.msra.gmra.mrb[12].mxu1 %vm1004_vm4, %v1499_v62  ;;  %v3966_v62 = vld [vmem:[%s4875_s14 + $0x38] sm:$0xff]  }
 0x5f3   : > { %1735 = vmatpush1.bf16.msra.mxu1 %v3947_v36  ;;  %1766 = vmatprep.mubr.bf16.mxu1 %v4127_v43 }
 0x6b9   : > { %v1088_v6 = vpop.f32.mrb[6].mxu1 }
 0x6ba   : > { %v3663_v7 = vpop.f32.mrb[7].mxu1 }
 0x6bd   : > { %v1246_v8 = vpop.f32.mrb[8].mxu1 }
 0x6be   : > { %1574 = vrot.lane.b32.xlu1 %v1246_v8, %s4892_s27  ;;  %v3673_v9 = vpop.f32.mrb[9].mxu1  ;;  %s4920_s27 = smov 80  }
 0x6c1   : > { %v1411_v10 = vpop.f32.mrb[10].mxu1 }
 0x6c2   : > { %1578 = vrot.lane.b32.xlu1 %v1411_v10, %s4894_s24  ;;  %v3683_v13 = vpop.f32.mrb[11].mxu1  ;;  %s4919_s24 = smov 96  }
 0x6c5   : > { %v1569_v14 = vpop.f32.mrb[12].mxu1 }
 0x6c6   : > { %1582 = vrot.lane.b32.xlu0 %v1569_v14, %s4916_s26  ;;  %v3693_v16 = vpop.f32.mrb[13].mxu1 }
 0x730   : > { %v1575_v17 = vpop.permute.xlu1 %1574 }
 0x731   : > { %v1585_v20 = vsel %vm928_vm3, %v1088_v6, %v1575_v17 }
 0x734   : > { %v1579_v19 = vpop.permute.xlu1 %1578 }
 0x735   : > { %v1586_v21 = vsel %vm846_vm2, %v1585_v20, %v1579_v19 }
 0x738   : > { %v1583_v22 = vpop.permute.xlu0 %1582 }
 0x739   : > { %v1588_v23 = vsel %vm1587_vm5, %v1586_v21, %v1583_v22 }
 0x73a   : > { %v1589_v24 = vpack.c.bf16 %v1588_v23, %v1588_v23  ;;  %v3967_v23 = vld [vmem:[%s4870_s9 + $0x20] sm:$0xff]  }
 0x73c   : > { %3703 = vmatmul.mubr.msk.bf16.vlgmr.msra.gmra.mrb[12].mxu0 %vm664_vm0, %v1589_v24  ;;  %v3969_v24 = vld [vmem:[%s4870_s9 + $0x30] sm:$0xff]  }
 0x73d   : > { %3722 = vmatprep.mubr.msk.bf16.mxu0 %vm4118_vm1, %v4117_v4  ;;  %3707 = vmatpush3.bf16.msra.mxu0 %v3959_v56 }
 0x73e   : > { %3708 = vmatprep.subr.bf16.mxu0 %v4117_v4 }
 0x741   : > { %3709 = vmatpush3.bf16.msra.mxu0 %v3960_v57 }
 0x742   : > { %3710 = vmatprep.subr.bf16.mxu0 %v4117_v4 }
 0x745   : > { %3711 = vmatpush3.bf16.msra.mxu0 %v3961_v35 }
 0x746   : > { %3712 = vmatprep.subr.bf16.mxu0 %v4117_v4 }
 0x749   : > { %3713 = vmatpush3.bf16.msra.mxu0 %v3962_v58 }
 0x74a   : > { %3714 = vmatprep.subr.bf16.mxu0 %v4117_v4 }
 0x74d   : > { %3715 = vmatpush3.bf16.msra.mxu0 %v3963_v59 }
 0x74e   : > { %3716 = vmatprep.subr.bf16.mxu0 %v4117_v4 }
 0x751   : > { %3717 = vmatpush3.bf16.msra.mxu0 %v3964_v60 }
 0x752   : > { %3718 = vmatprep.subr.bf16.mxu0 %v4117_v4 }
 0x755   : > { %3719 = vmatpush3.bf16.msra.mxu0 %v3965_v61 }
 0x756   : > { %3720 = vmatprep.subr.bf16.mxu0 %v4117_v4 }
 0x759   : > { %3721 = vmatpush3.bf16.msra.mxu0 %v3966_v62 }
 0x75a   : > { %3882 = vmatprep.subr.bf16.mxu0 %v4120_v11 }
 0x80f   : > { %v1659_v25 = vpop.f32.mrb[12].mxu0 }
 0x810   : > { %v4507_v26 = vadd.f32 %v1659_v25, %v4285_v0  ;;  %v3704_v27 = vpop.f32.mrb[13].mxu0  ;;  %v3952_v0 = vld [vmem:[%s4874_s13 + $0x14] ss:$8 sps:$4 sm:$0xff]  }
 0x811   : > { %v1662_v28 = vpop.f32.mrb[14].mxu0  ;;  %1736 = vmatprep.subr.bf16.mxu1 %v3952_v0  ;;  %v3970_v25 = vld [vmem:[%s4870_s9 + $0x38] sm:$0xff]  }
 0x812   : > { %v3705_v30 = vpop.f32.mrb[15].mxu0  ;;  %v1667_v31 = vmul.f32 %v4507_v26, %v4507_v26  ;;  %1737 = vmatpush1.bf16.msra.mxu1 %v3950_v37 }
 0x813   : > { %1738 = vmatprep.subr.bf16.mxu1 %v3955_v38 }
 0x814   : > { %v1668_v32 = vsel %vm664_vm0, %v1667_v31, 0.0  ;;  %v3412_v31 = vld [vmem:[%s4869_s8 + $0x1] ss:$0 sm:$0xff] }
 0x815   : > { %1669 = vadd.xlane.f32.xlu1 %v1668_v32 }
 0x816   : > { %1739 = vmatpush1.bf16.msra.mxu1 %v3953_v39 }
 0x817   : > { %1740 = vmatprep.subr.bf16.mxu1 %v3958_v42 }
 0x81a   : > { %1741 = vmatpush1.bf16.msra.mxu1 %v3956_v40 }
 0x81b   : > { %3726 = vmatprep.subr.bf16.mxu1 %v4117_v4 }
 0x8a2   : > { %v1670_v44 = vpop.xlane.xlu1 %1669 }
 0x8a3   : > { %v1671_v46 = vmul.f32 0.015625, %v1670_v44 }
 0x8a5   : > { %v1672_v47 = vadd.f32 1e-06, %v1671_v46 }
 0x8a7   : > { %4017 = vrsqrt.f32 %v1672_v47 }
 0x8b1   : > { %v4018_v48 = vpop.eup %4017 }
 0x8b2   : > { %v1674_v53 = vmul.f32 %v4018_v48, %v4507_v26 }
 0x8b4   : > { %v1681_v54 = vmul.f32 %v3392_v51, %v1674_v53 }
 0x8b6   : > { %v1682_v55 = vpack.c.bf16 %v1681_v54, %v1681_v54 }
 0x8b8   : > { %3401 = vmatmul.mubr.msk.bf16.vlgmr.msra.gmra.mrb[16].mxu1 %vm664_vm0, %v1682_v55 }
 0x8b9   : > { %3734 = vmatprep.mubr.msk.bf16.mxu1 %vm4118_vm1, %v4117_v4  ;;  %3727 = vmatpush3.bf16.msra.mxu1 %v3967_v23 }
 0x8ba   : > { %3728 = vmatprep.subr.bf16.mxu1 %v4117_v4 }
 0x98b   : > { %v1768_v1 = vpop.f32.mrb[16].mxu1 }
 0x98c   : > { %v3402_v2 = vmul.f32 -1.442695, %v1768_v1  ;;  %v1770_v3 = vpop.f32.mrb[17].mxu1 }
 0x98d   : > { %v1772_v5 = vpop.f32.mrb[18].mxu1 }
 0x98e   : > { %4019 = vpow2.f32 %v3402_v2  ;;  %v1773_v6 = vpop.f32.mrb[19].mxu1 }
 0x998   : > { %v4020_v7 = vpop.eup %4019 }
 0x999   : > { %v1778_v8 = vadd.f32 1.0, %v4020_v7 }
 0x99b   : > { %4021 = vrcp.f32 %v1778_v8 }
 0x9a5   : > { %v4022_v9 = vpop.eup %4021 }
 0x9a6   : > { %v1781_v10 = vmul.f32 %v4022_v9, %v1768_v1 }
 0x9a8   : > { %v1782_v13 = vmul.f32 %v1781_v10, %v1770_v3 }
 0x9aa   : > { %v1783_v14 = vpack.c.bf16 %v1782_v13, %v1782_v13 }
 0x9ac   : > { %3723 = vmatmul.mubr.bf16.vlgmr.msra.gmra.mrb[16].mxu0 %v1783_v14 }
 0x9ad   : > { %3884 = vmatpush3.bf16.msra.mxu0 %v4372_v34  ;;  %3765 = vmatprep.mubr.msk.f32.mxu0 %vm4118_vm1, %v4117_v4 }
 0x9ae   : > { %3885 = vmatprep.subr.bf16.mxu0 %v4120_v11 }
 0x9b1   : > { %3887 = vmatpush3.bf16.msra.mxu0 %v4387_v41  ;;  %v3968_v41 = vld [vmem:[%s4870_s9 + $0x28] sm:$0xff]  }
 0x9b2   : > { %3778 = vmatprep.subr.mxu0 %v4117_v4  ;;  %3729 = vmatpush3.bf16.msra.mxu1 %v3968_v41 }
 0x9b3   : > { %3730 = vmatprep.subr.bf16.mxu1 %v4117_v4 }
 0x9b6   : > { %3731 = vmatpush3.bf16.msra.mxu1 %v3969_v24 }
 0x9b7   : > { %3732 = vmatprep.subr.bf16.mxu1 %v4117_v4 }
 0x9ba   : > { %3733 = vmatpush3.bf16.msra.mxu1 %v3970_v25 }
 0x9bb   : > { %3870 = vmatprep.subr.bf16.mxu1 %v4120_v11 }
 0xa7f   : > { %v1882_v16 = vpop.f32.mrb[16].mxu0 }
 0xa80   : > { %v4585_v17 = vadd.f32 %v1882_v16, %v4507_v26  ;;  %v3724_v19 = vpop.f32.mrb[17].mxu0 }
 0xa81   : > { %v1885_v20 = vpop.f32.mrb[18].mxu0 }
 0xa82   : > { %v3725_v21 = vpop.f32.mrb[19].mxu0  ;;  %v1891_v22 = vmul.f32 %v4585_v17, %v4585_v17 }
 0xa84   : > { %v1892_v34 = vsel %vm664_vm0, %v1891_v22, 0.0 }
 0xa85   : > { %1893 = vadd.xlane.f32.xlu0 %v1892_v34 }
 0xb12   : > { %v1894_v26 = vpop.xlane.xlu0 %1893 }
 0xb13   : > { %v1895_v27 = vmul.f32 0.015625, %v1894_v26 }
 0xb15   : > { %v1896_v28 = vadd.f32 1e-06, %v1895_v27 }
 0xb17   : > { %4023 = vrsqrt.f32 %v1896_v28 }
 0xb21   : > { %v4024_v30 = vpop.eup %4023 }
 0xb22   : > { %v1898_v32 = vmul.f32 %v4024_v30, %v4585_v17 }
 0xb24   : > { %v1905_v33 = vmul.f32 %v3412_v31, %v1898_v32 }
 0xb26   : > { %v1906_v36 = vpack.c.bf16 %v1905_v33, %v1905_v33 }
 0xb28   : > { %3735 = vmatmul.mubr.msk.bf16.vlgmr.msra.gmra.mrb[20].mxu1 %vm664_vm0, %v1906_v36 }
 0xb29   : > { %3872 = vmatpush3.bf16.msra.mxu1 %v4322_v12  ;;  %3754 = vmatprep.mubr.msk.f32.mxu1 %vm4118_vm1, %v4117_v4  ;;  %v3422_v12 = vld [vmem:[%s4871_s10 + $0x1] ss:$0 sm:$0xff] }
 0xb2a   : > { %3873 = vmatprep.subr.bf16.mxu1 %v4120_v11 }
 0xb2d   : > { %3875 = vmatpush3.bf16.msra.mxu1 %v4331_v15 }
 0xb2e   : > { %3876 = vmatprep.subr.bf16.mxu1 %v4120_v11 }
 0xb31   : > { %3878 = vmatpush3.bf16.msra.mxu1 %v4341_v18 }
 0xb32   : > { %3879 = vmatprep.subr.bf16.mxu1 %v4120_v11 }
 0xb35   : > { %3881 = vmatpush3.bf16.msra.mxu1 %v4359_v29 }
 0xb36   : > { %3768 = vmatprep.subr.mxu1 %v4117_v4 }
 0xbfb   : > { %v1985_v0 = vpop.f32.mrb[20].mxu1 }
 0xbfc   : > { %v4624_v37 = vadd.f32 %v3422_v12, %v1985_v0  ;;  %v3736_v38 = vpop.f32.mrb[21].mxu1 }
 0xbfd   : > { %v1988_v39 = vpop.f32.mrb[22].mxu1 }
 0xbfe   : > { %2068 = vrot.lane.b32.xlu0 %v4624_v37, %s4917_s4  ;;  %v3737_v15 = vpop.f32.mrb[23].mxu1  ;;  %3755 = vmatmul.mubr.msk.f32.vlgmr.msra.gmra.mrb[14].mxu1 %vm664_vm0, %v4624_v37  ;;  %v1991_v29 = vmul.f32 %v4624_v37, %v4416_v52  ;;  %v2067_v51 = vmul.f32 %v4624_v37, %v4404_v49 }
 0xbff   : > { %3770 = vmatprep.mubr.msk.f32.mxu1 %vm4118_vm1, %v4117_v4 }
 0xc70   : > { %v2069_v11 = vpop.permute.xlu0 %2068 }
 0xc71   : > { %3766 = vmatmul.mubr.msk.f32.vlgmr.msra.gmra.mrb[10].mxu0 %vm846_vm2, %v2069_v11 }
 0xc72   : > { %3780 = vmatprep.mubr.msk.f32.mxu0 %vm4118_vm1, %v4117_v4 }
 0xcd1   : > { %v2061_v18 = vpop.f32.mrb[14].mxu1 }
 0xcd2   : > { %v2065_v40 = vmul.f32 %v2061_v18, %v4409_v50  ;;  %v3756_v42 = vpop.f32.mrb[15].mxu1 }
 0xcd4   : > { %v2066_v44 = vadd.f32 %v2065_v40, %v1991_v29 }
 0xcd6   : > { %2313 = vrot.lane.b32.xlu0 %v2066_v44, %s4918_s5 }
 0xcda   : > { %2471 = vrot.lane.b32.xlu0 %v2066_v44, %s4919_s24 }
 0xd44   : > { %v2138_v46 = vpop.f32.mrb[10].mxu0 }
 0xd45   : > { %v2142_v47 = vmul.f32 %v2138_v46, %v4400_v45  ;;  %v3767_v48 = vpop.f32.mrb[11].mxu0  ;;  %v3971_v46 = vld [vmem:[%s4872_s11 + $0x20] sm:$0xff]  }
 0xd46   : > { %v3973_v48 = vld [vmem:[%s4872_s11 + $0x30] sm:$0xff]  }
 0xd47   : > { %2144 = vrot.lane.b32.xlu1 %v2142_v47, %s4917_s4  ;;  %v3972_v47 = vld [vmem:[%s4872_s11 + $0x28] sm:$0xff]  }
 0xd48   : > { %v2314_v52 = vpop.permute.xlu0 %2313 }
 0xd4c   : > { %v2472_v49 = vpop.permute.xlu0 %2471 }
 0xdb9   : > { %v2145_v53 = vpop.permute.xlu1 %2144 }
 0xdba   : > { %v2147_v54 = vadd.f32 %v2145_v53, %v2067_v51 }
 0xdbc   : > { %2149 = vrot.lane.b32.xlu1 %v2147_v54, %s4917_s4 }
 0xdc0   : > { %2473 = vrot.lane.b32.xlu1 %v2147_v54, %s4916_s26 }
 0xdc4   : > { %2636 = vrot.lane.b32.xlu1 %v2066_v44, %s4920_s27  ;;  %s4821_s27 = scalar_lea.hbm %s4879_s18, %s3506_s20 }
 0xe2e   : > { %v2150_v50 = vpop.permute.xlu1 %2149 }
 0xe2f   : > { %3769 = vmatpush3.xpose.msk.msra.mxu1 %vm928_vm3, %v2150_v50  ;;  %3779 = vmatpush3.xpose.msk.msra.mxu0 %vm928_vm3, %v2150_v50 }
 0xe30   : > { %3788 = vmatprep.subr.mxu0 %v4117_v4  ;;  %3773 = vmatprep.subr.mxu1 %v4117_v4 }
 0xe32   : > { %3771 = vmatmul.mubr.msk.f32.vlgmr.msra.gmra.mrb[24].mxu1 %vm928_vm3, %v2066_v44  ;;  %3781 = vmatmul.mubr.msk.f32.vlgmr.msra.gmra.mrb[20].mxu0 %vm928_vm3, %v2314_v52  ;;  %v2474_v45 = vpop.permute.xlu1 %2473 }
 0xe33   : > { %3789 = vmatpush3.xpose.msk.msra.mxu0 %vm928_vm3, %v2474_v45  ;;  %3790 = vmatprep.mubr.msk.f32.mxu0 %vm4118_vm1, %v4117_v4 }
 0xe34   : > { %3798 = vmatprep.subr.mxu0 %v4117_v4  ;;  %3775 = vmatprep.mubr.msk.f32.mxu1 %vm4118_vm1, %v4117_v4 }
 0xe36   : > { %3791 = vmatmul.mubr.msk.f32.vlgmr.msra.gmra.mrb[22].mxu0 %vm928_vm3, %v2472_v49  ;;  %v2637_v55 = vpop.permute.xlu1 %2636 }
 0xe37   : > { %3799 = vmatpush3.xpose.msk.msra.mxu0 %vm928_vm3, %v2474_v45  ;;  %3800 = vmatprep.mubr.msk.f32.mxu0 %vm4118_vm1, %v4117_v4 }
 0xe38   : > { %3808 = vmatprep.subr.bf16.mxu0 %v4117_v4 }
 0xe3a   : > { %3801 = vmatmul.mubr.msk.f32.vlgmr.msra.gmra.mrb[24].mxu0 %vm928_vm3, %v2637_v55 }
 0xe3b   : > { %3816 = vmatprep.mubr.msk.bf16.mxu0 %vm4118_vm1, %v4117_v4  ;;  %3809 = vmatpush3.bf16.msra.mxu0 %v3971_v46 }
 0xe3c   : > { %3810 = vmatprep.subr.bf16.mxu0 %v4117_v4 }
 0xe3f   : > { %3811 = vmatpush3.bf16.msra.mxu0 %v3972_v47 }
 0xe40   : > { %3812 = vmatprep.subr.bf16.mxu0 %v4117_v4 }
 0xe43   : > { %3813 = vmatpush3.bf16.msra.mxu0 %v3973_v48 }
 0xe44   : > { %3814 = vmatprep.subr.bf16.mxu0 %v4117_v4 }
 0xf05   : > { %v2222_v56 = vpop.f32.mrb[24].mxu1  ;;  %v2383_v57 = vpop.f32.mrb[20].mxu0 }
 0xf06   : > { %v2223_v35 = vadd.f32 %v2222_v56, %v4450_v63  ;;  %v2384_v58 = vadd.f32 %v2383_v57, %v4450_v63  ;;  %v3772_v59 = vpop.f32.mrb[25].mxu1  ;;  %v3782_v60 = vpop.f32.mrb[21].mxu0 }
 0xf08   : > { %v2226_v61 = vsel %vm1004_vm4, %v2223_v35, -inf  ;;  %v2387_v62 = vsel %vm1004_vm4, %v2384_v58, -inf }
 0xf09   : > { %2227 = vmax.xlane.f32.xlu0 %v2226_v61  ;;  %2388 = vmax.xlane.f32.xlu1 %v2387_v62  ;;  %v2545_v1 = vpop.f32.mrb[22].mxu0 }
 0xf0a   : > { %v2546_v2 = vadd.f32 %v2545_v1, %v4450_v63  ;;  %v3792_v3 = vpop.f32.mrb[23].mxu0 }
 0xf0c   : > { %v2549_v5 = vsel %vm1004_vm4, %v2546_v2, -inf }
 0xf0d   : > { %2550 = vmax.xlane.f32.xlu0 %v2549_v5  ;;  %v2706_v6 = vpop.f32.mrb[24].mxu0 }
 0xf0e   : > { %v2707_v7 = vadd.f32 %v2706_v6, %v4450_v63  ;;  %v3802_v8 = vpop.f32.mrb[25].mxu0 }
 0xf0f   : > { %v3977_v8 = vld [vmem:[%s4874_s13 + $0x44] ss:$8 sps:$4 sm:$0xff]  }
 0xf10   : > { %v2710_v9 = vsel %vm1004_vm4, %v2707_v7, -inf }
 0xf11   : > { %2711 = vmax.xlane.f32.xlu0 %v2710_v9  ;;  %v3975_v9 = vld [vmem:[%s4874_s13 + $0x40] ss:$8 sps:$4 sm:$0xff]  }
 0xf96   : > { %v2228_v10 = vpop.xlane.xlu0 %2227  ;;  %v2389_v13 = vpop.xlane.xlu1 %2388 }
 0xf97   : > { %v2229_v14 = vsub.f32 %v2223_v35, %v2228_v10  ;;  %v2390_v16 = vsub.f32 %v2384_v58, %v2389_v13  ;;  %v3978_v10 = vld [vmem:[%s4874_s13 + $0x50] ss:$8 sps:$4 sm:$0xff]   ;;  %v3983_v13 = vld [vmem:[%s4874_s13 + $0x64] ss:$8 sps:$4 sm:$0xff]  }
 0xf99   : > { %v2230_v19 = vmul.f32 1.442695, %v2229_v14  ;;  %v2391_v20 = vmul.f32 1.442695, %v2390_v16  ;;  %v3981_v14 = vld [vmem:[%s4874_s13 + $0x60] ss:$8 sps:$4 sm:$0xff]  }
 0xf9a   : > { %v2551_v21 = vpop.xlane.xlu0 %2550  ;;  %v3984_v16 = vld [vmem:[%s4874_s13 + $0x70] ss:$8 sps:$4 sm:$0xff]  }
 0xf9b   : > { %4025 = vpow2.f32 %v2230_v19  ;;  %v2552_v22 = vsub.f32 %v2546_v2, %v2551_v21  ;;  %v3986_v19 = vld [vmem:[%s4874_s13 + $0x74] ss:$8 sps:$4 sm:$0xff]  }
 0xf9c   : > { %4027 = vpow2.f32 %v2391_v20 }
 0xf9d   : > { %v2553_v34 = vmul.f32 1.442695, %v2552_v22 }
 0xf9e   : > { %v2712_v23 = vpop.xlane.xlu0 %2711 }
 0xf9f   : > { %4029 = vpow2.f32 %v2553_v34  ;;  %v2713_v41 = vsub.f32 %v2707_v7, %v2712_v23  ;;  %v3456_v23 = vld [vmem:[%s4873_s12 + $0x1] ss:$0 sm:$0xff] }
 0xfa1   : > { %v2714_v24 = vmul.f32 1.442695, %v2713_v41 }
 0xfa3   : > { %4031 = vpow2.f32 %v2714_v24 }
 0xfa5   : > { %v4026_v63 = vpop.eup %4025 }
 0xfa6   : > { %v4028_v25 = vpop.eup %4027  ;;  %v2232_v26 = vsel %vm1004_vm4, %v4026_v63, 0.0 }
 0xfa7   : > { %2233 = vadd.xlane.f32.xlu1 %v2232_v26  ;;  %v2393_v27 = vsel %vm1004_vm4, %v4028_v25, 0.0  ;;  %v3988_v26 = vld [vmem:[%s4875_s14 + $0x48] sm:$0xff]  }
 0xfa8   : > { %2394 = vadd.xlane.f32.xlu0 %v2393_v27  ;;  %v3989_v27 = vld [vmem:[%s4875_s14 + $0x50] sm:$0xff]  }
 0xfa9   : > { %v4030_v28 = vpop.eup %4029 }
 0xfaa   : > { %v2555_v30 = vsel %vm1004_vm4, %v4030_v28, 0.0 }
 0xfab   : > { %2556 = vadd.xlane.f32.xlu1 %v2555_v30  ;;  %v3991_v30 = vld [vmem:[%s4875_s14 + $0x60] sm:$0xff]  }
 0xfad   : > { %v4032_v31 = vpop.eup %4031 }
 0xfae   : > { %v2716_v32 = vsel %vm1004_vm4, %v4032_v31, 0.0 }
 0xfaf   : > { %2717 = vadd.xlane.f32.xlu0 %v2716_v32  ;;  %v3993_v32 = vld [vmem:[%s4875_s14 + $0x70] sm:$0xff]  }
 0xfbc   : > { %2237 = vrot.lane.b32.xlu1 %v4624_v37, %s4921_s2 }
 0xfc5   : > { %2560 = vrot.lane.b32.xlu0 %v4624_v37, %s4922_s29 }
0x1034   : > { %v2234_v33 = vpop.xlane.xlu1 %2233 }
0x1035   : > { %4033 = vrcp.f32 %v2234_v33  ;;  %v2395_v36 = vpop.xlane.xlu0 %2394  ;;  %v3994_v33 = vld [vmem:[%s4875_s14 + $0x78] sm:$0xff]  }
0x1036   : > { %4035 = vrcp.f32 %v2395_v36 }
0x1038   : > { %v2557_v12 = vpop.xlane.xlu1 %2556 }
0x1039   : > { %4037 = vrcp.f32 %v2557_v12 }
0x103c   : > { %v2238_v0 = vpop.permute.xlu1 %2237  ;;  %v2718_v38 = vpop.xlane.xlu0 %2717 }
0x103d   : > { %3774 = vmatpush3.msra.mxu1 %v2238_v0  ;;  %4039 = vrcp.f32 %v2718_v38 }
0x103e   : > { %3783 = vmatprep.subr.mxu1 %v4117_v4 }
0x103f   : > { %v4034_v39 = vpop.eup %4033 }
0x1040   : > { %v2236_v15 = vmul.f32 %v4034_v39, %v4026_v63  ;;  %v4036_v11 = vpop.eup %4035  ;;  %v2561_v29 = vpop.permute.xlu0 %2560 }
0x1041   : > { %v2397_v37 = vmul.f32 %v4036_v11, %v4028_v25  ;;  %v3987_v25 = vld [vmem:[%s4875_s14 + $0x40] sm:$0xff]  }
0x1042   : > { %3776 = vmatmul.mubr.msk.f32.vlgmr.msra.gmra.mrb[26].mxu1 %vm1004_vm4, %v2236_v15 }
0x1043   : > { %3784 = vmatpush3.msra.mxu1 %v2238_v0  ;;  %3785 = vmatprep.mubr.msk.f32.mxu1 %vm4118_vm1, %v4117_v4  ;;  %v4038_v18 = vpop.eup %4037 }
0x1044   : > { %3793 = vmatprep.subr.mxu1 %v4117_v4  ;;  %v2559_v40 = vmul.f32 %v4038_v18, %v4030_v28  ;;  %v3990_v28 = vld [vmem:[%s4875_s14 + $0x58] sm:$0xff]  }
0x1046   : > { %3786 = vmatmul.mubr.msk.f32.vlgmr.msra.gmra.mrb[28].mxu1 %vm1004_vm4, %v2397_v37 }
0x1047   : > { %3794 = vmatpush3.msra.mxu1 %v2561_v29  ;;  %3795 = vmatprep.mubr.msk.f32.mxu1 %vm4118_vm1, %v4117_v4  ;;  %v4040_v42 = vpop.eup %4039 }
0x1048   : > { %3803 = vmatprep.subr.mxu1 %v4117_v4  ;;  %v2720_v44 = vmul.f32 %v4040_v42, %v4032_v31  ;;  %v3992_v31 = vld [vmem:[%s4875_s14 + $0x68] sm:$0xff]  }
0x104a   : > { %3796 = vmatmul.mubr.msk.f32.vlgmr.msra.gmra.mrb[30].mxu1 %vm1004_vm4, %v2559_v40 }
0x104b   : > { %3804 = vmatpush3.msra.mxu1 %v2561_v29  ;;  %3805 = vmatprep.mubr.msk.f32.mxu1 %vm4118_vm1, %v4117_v4 }
0x104c   : > { %2957 = vmatprep.subr.bf16.mxu1 %v3977_v8 }
0x104e   : > { %3806 = vmatmul.mubr.msk.f32.vlgmr.msra.gmra.mrb[32].mxu1 %vm1004_vm4, %v2720_v44 }
0x104f   : > { %2989 = vmatprep.mubr.bf16.mxu1 %v4127_v43  ;;  %v3974_v43 = vld [vmem:[%s4872_s11 + $0x38] sm:$0xff]   ;;  %2958 = vmatpush1.bf16.msra.mxu1 %v3975_v9 }
0x1050   : > { %3815 = vmatpush3.bf16.msra.mxu0 %v3974_v43 }
0x1051   : > { %3820 = vmatprep.subr.bf16.mxu0 %v4117_v4 }
0x1115   : > { %v2309_v51 = vpop.f32.mrb[26].mxu1 }
0x1116   : > { %v3777_v53 = vpop.f32.mrb[27].mxu1 }
0x1117   : > { %v3995_v53 = vld [vmem:[%s4877_s16] sm:$0xff]  }
0x1119   : > { %v2467_v54 = vpop.f32.mrb[28].mxu1 }
0x111a   : > { %2795 = vrot.lane.b32.xlu1 %v2467_v54, %s4922_s29  ;;  %v3787_v50 = vpop.f32.mrb[29].mxu1  ;;  %v3996_v54 = vld [vmem:[%s4877_s16 + $0x8] sm:$0xff]  }
0x111b   : > { %v3997_v50 = vld [vmem:[%s4877_s16 + $0x10] sm:$0xff]  }
0x111d   : > { %v2632_v52 = vpop.f32.mrb[30].mxu1 }
0x111e   : > { %2799 = vrot.lane.b32.xlu1 %v2632_v52, %s4921_s2  ;;  %v3797_v45 = vpop.f32.mrb[31].mxu1  ;;  %v3998_v52 = vld [vmem:[%s4877_s16 + $0x18] sm:$0xff]  }
0x1121   : > { %v2790_v49 = vpop.f32.mrb[32].mxu1 }
0x1122   : > { %2803 = vrot.lane.b32.xlu0 %v2790_v49, %s4916_s26  ;;  %v3807_v55 = vpop.f32.mrb[33].mxu1  ;;  %s618_s26 = sand.u32 1, %s4107_s30  }
0x1123   : > { %s3361_s2 = sshll.u32 %s618_s26, 3 }
0x1124   : > { %s620_s29 = scalar_lea.vmem [#allocation2], %s3361_s2  ;;  %s3230_s2 = scalar_lea.sflag [#allocation3], %s618_s26 }
0x1125   : > { %s3247_s4 = sshll.u32 %s620_s29, 4  ;;  %s3248_s4 = int_to_ptr.vmem [resolvable:$true] %s3247_s4 }
0x1126   : > { %s4053_s22 = scalar_lea.vmem %s3248_s4, 128 }
0x1127   : > { %p4054_p11 = scmp.ne.s32.totalorder %s3248_s4, %s4053_s22 }
0x1129   : > { %p4055_p12 = pnand %p4054_p11, %p4267_p5 }
0x112b   : > { %p4056_p13 = pneg %p4055_p12 }
0x118c   : > { %v2796_v56 = vpop.permute.xlu1 %2795 }
0x118d   : > { %v2806_v35 = vsel %vm928_vm3, %v2309_v51, %v2796_v56 }
0x1190   : > { %v2800_v57 = vpop.permute.xlu1 %2799 }
0x1191   : > { %v2807_v58 = vsel %vm846_vm2, %v2806_v35, %v2800_v57  ;;  %v3499_v57 = vld [vmem:[%s4876_s15] ss:$0 sm:$0xff] }
0x1194   : > { %v2804_v59 = vpop.permute.xlu0 %2803 }
0x1195   : > { %v2808_v60 = vsel %vm1587_vm5, %v2807_v58, %v2804_v59 }
0x1196   : > { %v2809_v61 = vpack.c.bf16 %v2808_v60, %v2808_v60 }
0x1198   : > { %3817 = vmatmul.mubr.msk.bf16.vlgmr.msra.gmra.mrb[28].mxu0 %vm664_vm0, %v2809_v61 }
0x1199   : > { %3836 = vmatprep.mubr.msk.bf16.mxu0 %vm4118_vm1, %v4117_v4  ;;  %3821 = vmatpush3.bf16.msra.mxu0 %v3987_v25 }
0x119a   : > { %3822 = vmatprep.subr.bf16.mxu0 %v4117_v4 }
0x119d   : > { %3823 = vmatpush3.bf16.msra.mxu0 %v3988_v26 }
0x119e   : > { %3824 = vmatprep.subr.bf16.mxu0 %v4117_v4 }
0x11a1   : > { %3825 = vmatpush3.bf16.msra.mxu0 %v3989_v27 }
0x11a2   : > { %3826 = vmatprep.subr.bf16.mxu0 %v4117_v4 }
0x11a5   : > { %3827 = vmatpush3.bf16.msra.mxu0 %v3990_v28 }
0x11a6   : > { %3828 = vmatprep.subr.bf16.mxu0 %v4117_v4 }
0x11a9   : > { %3829 = vmatpush3.bf16.msra.mxu0 %v3991_v30 }
0x11aa   : > { %3830 = vmatprep.subr.bf16.mxu0 %v4117_v4 }
0x11ad   : > { %3831 = vmatpush3.bf16.msra.mxu0 %v3992_v31 }
0x11ae   : > { %3832 = vmatprep.subr.bf16.mxu0 %v4117_v4 }
0x11b1   : > { %3833 = vmatpush3.bf16.msra.mxu0 %v3993_v32 }
0x11b2   : > { %3834 = vmatprep.subr.bf16.mxu0 %v4117_v4 }
0x11b5   : > { %3835 = vmatpush3.bf16.msra.mxu0 %v3994_v33 }
0x126b   : > { %v2880_v62 = vpop.f32.mrb[28].mxu0 }
0x126c   : > { %v4723_v1 = vadd.f32 %v2880_v62, %v4585_v17  ;;  %v3818_v2 = vpop.f32.mrb[29].mxu0  ;;  %v3980_v17 = vld [vmem:[%s4874_s13 + $0x54] ss:$8 sps:$4 sm:$0xff]  }
0x126d   : > { %v2883_v3 = vpop.f32.mrb[30].mxu0  ;;  %2959 = vmatprep.subr.bf16.mxu1 %v3980_v17 }
0x126e   : > { %v3819_v5 = vpop.f32.mrb[31].mxu0  ;;  %v2889_v6 = vmul.f32 %v4723_v1, %v4723_v1  ;;  %2960 = vmatpush1.bf16.msra.mxu1 %v3978_v10 }
0x126f   : > { %2961 = vmatprep.subr.bf16.mxu1 %v3983_v13 }
0x1270   : > { %v2890_v7 = vsel %vm664_vm0, %v2889_v6, 0.0  ;;  %v3217_v6 = vlaneseq }
0x1271   : > { %2891 = vadd.xlane.f32.xlu1 %v2890_v7 }
0x1272   : > { %2962 = vmatpush1.bf16.msra.mxu1 %v3981_v14  ;;  %v3218_v7 = vand.u32 127, %v3217_v6 }
0x1273   : > { %2963 = vmatprep.subr.bf16.mxu1 %v3986_v19 }
0x1276   : > { %2964 = vmatpush1.bf16.msra.mxu1 %v3984_v16 }
0x1277   : > { %3840 = vmatprep.subr.bf16.mxu1 %v4117_v4 }
0x12fe   : > { %v2892_v20 = vpop.xlane.xlu1 %2891 }
0x12ff   : > { %v2893_v21 = vmul.f32 0.015625, %v2892_v20 }
0x1301   : > { %v2894_v22 = vadd.f32 1e-06, %v2893_v21 }
0x1303   : > { %4041 = vrsqrt.f32 %v2894_v22 }
0x130d   : > { %v4042_v34 = vpop.eup %4041 }
0x130e   : > { %v2896_v41 = vmul.f32 %v4042_v34, %v4723_v1 }
0x1310   : > { %v2903_v24 = vmul.f32 %v3456_v23, %v2896_v41 }
0x1312   : > { %v2904_v63 = vpack.c.bf16 %v2903_v24, %v2903_v24 }
0x1314   : > { %3473 = vmatmul.mubr.msk.bf16.vlgmr.msra.gmra.mrb[36].mxu1 %vm664_vm0, %v2904_v63 }
0x1315   : > { %3848 = vmatprep.mubr.msk.bf16.mxu1 %vm4118_vm1, %v4117_v4  ;;  %3841 = vmatpush3.bf16.msra.mxu1 %v3995_v53 }
0x1316   : > { %3842 = vmatprep.subr.bf16.mxu1 %v4117_v4 }
0x1319   : > { %3843 = vmatpush3.bf16.msra.mxu1 %v3996_v54 }
0x131a   : > { %3844 = vmatprep.subr.bf16.mxu1 %v4117_v4 }
0x131d   : > { %3845 = vmatpush3.bf16.msra.mxu1 %v3997_v50 }
0x131e   : > { %3846 = vmatprep.subr.bf16.mxu1 %v4117_v4 }
0x1321   : > { %3847 = vmatpush3.bf16.msra.mxu1 %v3998_v52 }
0x13e7   : > { %v2991_v36 = vpop.f32.mrb[36].mxu1 }
0x13e8   : > { %v3474_v12 = vmul.f32 -1.442695, %v2991_v36  ;;  %v2993_v0 = vpop.f32.mrb[37].mxu1 }
0x13e9   : > { %v2995_v38 = vpop.f32.mrb[38].mxu1 }
0x13ea   : > { %4043 = vpow2.f32 %v3474_v12  ;;  %v2996_v39 = vpop.f32.mrb[39].mxu1 }
0x13f4   : > { %v4044_v15 = vpop.eup %4043 }
0x13f5   : > { %v3001_v11 = vadd.f32 1.0, %v4044_v15 }
0x13f7   : > { %4045 = vrcp.f32 %v3001_v11 }
0x1401   : > { %v4046_v37 = vpop.eup %4045 }
0x1402   : > { %v3004_v18 = vmul.f32 %v4046_v37, %v2991_v36 }
0x1404   : > { %v3005_v29 = vmul.f32 %v3004_v18, %v2993_v0 }
0x1406   : > { %v3006_v40 = vpack.c.bf16 %v3005_v29, %v3005_v29 }
0x1408   : > { %3837 = vmatmul.mubr.bf16.vlgmr.msra.gmra.mrb[32].mxu0 %v3006_v40 }
0x14db   : > { %v3106_v42 = vpop.f32.mrb[32].mxu0 }
0x14dc   : > { %v3112_v44 = vadd.f32 %v3106_v42, %v4723_v1  ;;  %v3838_v46 = vpop.f32.mrb[33].mxu0  ;;  %v3206_v1 = vld [vmem:[%s638_s25] sm:$0xff]  ;;  %s4057_s25 = sshll.u32 %s4128_s23, 4  ;;  %s4058_s25 = int_to_ptr.vmem [resolvable:$false] %s4057_s25 }
0x14dd   : > { %v3109_v47 = vpop.f32.mrb[34].mxu0  ;;  %s4059_s6 = scalar_lea.vmem %s4058_s25, 256  ;;  %p4060_p0 = scmp.lt.s32.totalorder %s3248_s4, %s4058_s25 }
0x14de   : > { %v3839_v48 = vpop.f32.mrb[35].mxu0  ;;  %v3114_v43 = vmul.f32 %v3112_v44, %v3112_v44  ;;  %p4061_p1 = scmp.lt.s32.totalorder %s4059_s6, %s4053_s22 }
0x14e0   : > { %v3115_v51 = vsel %vm664_vm0, %v3114_v43, 0.0  ;;  %p4062_p2 = por %p4061_p1, %p4060_p0 }
0x14e1   : > { %3116 = vadd.xlane.f32.xlu0 %v3115_v51 }
0x14e2   : > { %p4063_p3 = pnand %p4062_p2, %p4056_p13 }
0x156e   : > { %v3117_v45 = vpop.xlane.xlu0 %3116 }
0x156f   : > { %v3118_v49 = vmul.f32 0.015625, %v3117_v45 }
0x1571   : > { %v3119_v55 = vadd.f32 1e-06, %v3118_v49 }
0x1573   : > { %4047 = vrsqrt.f32 %v3119_v55 }
0x157d   : > { %v4048_v56 = vpop.eup %4047 }
0x157e   : > { %v3121_v35 = vmul.f32 %v4048_v56, %v3112_v44 }
0x1580   : > { %v3128_v58 = vmul.f32 %v3499_v57, %v3121_v35 }
0x1582   : > { %v3129_v59 = vpack.c.bf16 %v3128_v58, %v3128_v58 }
0x1584   : > { %3849 = vmatmul.mubr.msk.bf16.vlgmr.msra.gmra.mrb[40].mxu1 %vm664_vm0, %v3129_v59 }
0x1657   : > { %v3199_v60 = vpop.f32.mrb[40].mxu1 }
0x1658   : > { %3207 = vmax.xlane.f32.xlu0 %v3199_v60  ;;  %v3850_v4 = vpop.f32.mrb[41].mxu1  ;;  %3205 = vst [vmem:[%s620_s29] sm:$0xff] %v3199_v60 }
0x1659   : > { %v3202_v61 = vpop.f32.mrb[42].mxu1 }
0x165a   : > { %v3851_v62 = vpop.f32.mrb[43].mxu1 }
0x166e   : > { %3220 = vperm.xlu0 %3938, %v3206_v1  }
0x16e5   : > { %v3208_v2 = vpop.xlane.xlu0 %3207 }
0x16e6   : > { %v3209_v3 = vsub.f32 %v3199_v60, %v3208_v2 }
0x16e8   : > { %v3210_v5 = vmul.f32 1.442695, %v3209_v3 }
0x16ea   : > { %4049 = vpow2.f32 %v3210_v5 }
0x16ed   : > { %v3221_v8 = vpop.permute.xlu0 %3220 }
0x16ee   : > { %vm3222_vm6 = vcmp.eq.s32.totalorder %v3218_v7, %v3221_v8 }
0x16ef   : > { %v3223_v17 = vsel %vm3222_vm6, %v3199_v60, 0.0 }
0x16f4   : > { %v4050_v9 = vpop.eup %4049 }
0x16f5   : > { %3212 = vadd.xlane.f32.xlu1 %v4050_v9 }
0x16f9   : > { %3224 = vadd.xlane.f32.xlu1 %v3223_v17 }
0x16fa   : > { %4066 = shalt.err (!%p4063_p3)
}
0x16fb   : > { %s4067_s1 = scalar_lea.hbm %s4821_s27, 128  ;;  %s4071_s20 = scalar_lea.hbm %s4879_s18, 256 }
0x16fc   : > { %p4068_p4 = scmp.ne.s32.totalorder %s4821_s27, %s4067_s1  ;;  %p4072_p9 = scmp.lt.u32.totalorder %s4821_s27, %s4879_s18 }
0x16fd   : > { %p4073_p10 = scmp.lt.u32.totalorder %s4071_s20, %s4067_s1  ;;  %p4075_p12 = scmp.lt.u32.totalorder %s4067_s1, %s4821_s27 }
0x16fe   : > { %p4069_p7 = pnand %p4068_p4, %p4267_p5 }
0x16ff   : > { %p4074_p11 = por %p4073_p10, %p4072_p9 }
0x1700   : > { %p4070_p8 = pneg %p4069_p7 }
0x1701   : > { %p4076_p13 = por %p4075_p12, %p4074_p11 }
0x1703   : > { %p4077_p0 = pnand %p4076_p13, %p4070_p8 }
0x1705   : > { %4080 = shalt.err (!%p4077_p0)
}
0x1706   : > { %3888 = dma.vmem_to_hbm [thread:$0]  (%p4267_p5), %s3248_s4, 128, %s4821_s27, %s3230_s2   ;;  %vm3227_vm7 = vcmask 7168  }
0x1707   : > { %s642_s23 = scalar_lea.vmem %s4880_s19, %s4279_s28 }
0x1782   : > { %v3213_v10 = vpop.xlane.xlu1 %3212 }
0x1783   : > { %4051 = vlog2.f32 %v3213_v10 }
0x1786   : > { %v3225_v19 = vpop.xlane.xlu1 %3224 }
0x178d   : > { %v4052_v13 = vpop.eup %4051 }
0x178e   : > { %v3215_v14 = vmul.f32 0.6931472, %v4052_v13 }
0x1790   : > { %v3216_v16 = vadd.f32 %v3215_v14, %v3208_v2 }
0x1792   : > { %v3226_v20 = vsub.f32 %v3216_v16, %v3225_v19 }
0x1794   : > { %3228 = vst.msk [vmem:[%s642_s23] sm:$0xff] %vm3227_vm7, %v3226_v20 }
0x1795 PF: > { %p3894_p1 = scmp.ge.s32.totalorder %s4115_s21, 2  ;;  %s3262_s25 = sand.u32 1, %s4103_s0  }
0x1796   : > { %s3263_s4 = scalar_lea.sflag [#allocation3], %s3262_s25 }
0x1797   : > { %p3891_p5 = pnand %p3894_p1, %p4271_p6 }
0x1799   : > { %4098 = dma.done.wait (!%p3891_p5), %s3263_s4, 128  }
0x179a   : > { %4100 = vsyncadd (!%p3891_p5), %s3263_s4, 4294967168  ;;  %s4924_s21 = sld [smem:[#allocation6_spill]]  ;;  %s4925_s27 = sld [smem:[#allocation5_spill]] }
0x179b   : > { %s4926_s20 = sld [smem:[#allocation7_spill]]  ;;  %s4927_s0 = smov %s4107_s30 }
0x17a0   : > { %p30_p2 = scmp.ge.s32.totalorder %s4924_s21, 4   ;;  %s4928_s30 = smov %s4925_s27 }
0x17a2   :  { %32 = sbr.rel (!%p30_p2) target bundleno = 11 (0xb), region = 152 }
0x17a9   :  { %3275 = vsyncpa [#allocation3], 1 }
0x17aa   :  { %3277 = vsyncpa [#allocation3 + $0x1], 1 }

</bundles_post_ra>
